<compile_context>
chip_gen: v6e
topology: v6e:2x2x1
jax: 0.10.0
libtpu: 0.0.40
codegen_flags: <defaults>
</compile_context>

<pallas_src>
import math
import functools

import jax
import jax.numpy as jnp
from jax.experimental import pallas as pl
from jax.experimental.pallas import tpu as pltpu

# ----------------------------- small test config -----------------------------
B = 4            # batch
T = 8            # time steps (multiple of 8 sublanes and of CHUNK_LEN)
D = 32           # in_channels / ninp (model width)
NHEAD = 2        # attention heads
HEAD_DIM = D // NHEAD
NHID = 64        # FFN hidden size
NLAYERS = 2      # encoder layers
OUT_FEATS = 16   # pose feature dim (104 in the original config)
OUT_PAD = ((OUT_FEATS + 127) // 128) * 128   # lane-dense decoder output width
CHUNK_LEN = 4
MASK_PERCENT = 0.8
AUDIO_F = 128    # x (audio) is unused by LateLM_G.forward; kept for signature parity
BATCH_BLOCK = 2  # batch elements folded into the matmul M dim per grid step


# --------------------------------- kernel ------------------------------------
def _layer_norm(x, g, b, eps=1e-5):
    mu = jnp.mean(x, axis=-1, keepdims=True)
    var = jnp.mean(jnp.square(x - mu), axis=-1, keepdims=True)
    return (x - mu) * jax.lax.rsqrt(var + eps) * g + b


def fused_lm_kernel(y_ref, keep_ref, pe_ref,
                    wqkv_ref, bqkv_ref, wo_ref, bo_ref, g1_ref, be1_ref,
                    w1_ref, b1_ref, w2_ref, b2_ref, g2_ref, be2_ref,
                    dw_ref, db_ref, o_ref, *, nlayers, nhead, bb, t):
    """One batch-block per grid step: embed -> N encoder layers -> decoder.

    Activation is kept as a lane-dense (M, D) = (bb*t, D) f32 tensor; all
    projections run over all M rows at once.  Attention is per (batch, head)
    via static lane/row slices (heads split only logically).
    """
    m, d = y_ref.shape            # m = bb * t
    hd = d // nhead
    sm_scale = jnp.float32(1.0 / math.sqrt(hd))

    # ---- embedding: MLM zero-mask, * sqrt(ninp), + positional encoding ----
    h = (y_ref[...] * keep_ref[...] * jnp.float32(math.sqrt(d))
         + pe_ref[...])                                                  # (M, D) f32

    # Static unroll is fine for the 2-layer toy config (see TODO above for
    # production NLAYERS).
    for l in range(nlayers):
        x = h                                                            # (M, D) f32
        xb = x.astype(jnp.bfloat16)

        # --- fused QKV: one (M, D) @ (D, 3D) matmul ---
        qkv = jnp.dot(xb, wqkv_ref[l],
                      preferred_element_type=jnp.float32) + bqkv_ref[l]  # (M, 3D)
        q = qkv[:, 0 * d:1 * d] * sm_scale                               # (M, D)
        k = qkv[:, 1 * d:2 * d]
        v = qkv[:, 2 * d:3 * d]

        # --- self-attention: per (batch, head), 2-D matmuls only ---
        ctx_rows = []
        for bi in range(bb):
            r0 = bi * t
            head_ctx = []
            for hh in range(nhead):
                c0 = hh * hd
                qh = q[r0:r0 + t, c0:c0 + hd].astype(jnp.bfloat16)        # (T, hd)
                kh = k[r0:r0 + t, c0:c0 + hd].astype(jnp.bfloat16)
                vh = v[r0:r0 + t, c0:c0 + hd].astype(jnp.bfloat16)
                s = jnp.dot(qh, kh.T, preferred_element_type=jnp.float32)  # (T, T)
                s = s - jnp.max(s, axis=-1, keepdims=True)
                e = jnp.exp(s)
                p = e * pl.reciprocal(jnp.sum(e, axis=-1, keepdims=True),
                                      approx=True)
                head_ctx.append(jnp.dot(p.astype(jnp.bfloat16), vh,
                                        preferred_element_type=jnp.float32))
            ctx_rows.append(jnp.concatenate(head_ctx, axis=-1))           # (T, D)
        ctx = (ctx_rows[0] if bb == 1
               else jnp.concatenate(ctx_rows, axis=0))                    # (M, D)

        # --- output projection: single K=D matmul (head merge is the concat) ---
        attn = jnp.dot(ctx.astype(jnp.bfloat16), wo_ref[l],
                       preferred_element_type=jnp.float32) + bo_ref[l]    # (M, D)

        # post-norm residual block 1
        x = _layer_norm(x + attn, g1_ref[l], be1_ref[l])

        # --- feed-forward (ReLU) ---
        ff = jnp.dot(x.astype(jnp.bfloat16), w1_ref[l],
                     preferred_element_type=jnp.float32) + b1_ref[l]
        ff = jnp.maximum(ff, 0.0)
        ff = jnp.dot(ff.astype(jnp.bfloat16), w2_ref[l],
                     preferred_element_type=jnp.float32) + b2_ref[l]

        # post-norm residual block 2
        h = _layer_norm(x + ff, g2_ref[l], be2_ref[l])

    # ---- decoder (lane-dense padded output, all M rows at once) ----
    o_ref[...] = (jnp.dot(h.astype(jnp.bfloat16), dw_ref[...],
                          preferred_element_type=jnp.float32)
                  + db_ref[...]).astype(o_ref.dtype)


# ------------------------------ pallas wrapper --------------------------------
def _full_block_spec(x):
    ndim = x.ndim
    return pl.BlockSpec(x.shape, lambda i, _nd=ndim: (0,) * _nd)


def fused_forward(y, keep_mask, pe, params):
    """y: (B, T, D), keep_mask: (B, T, 1), pe: (T, D) -> (B, T, OUT_FEATS)."""
    b, t, d = y.shape
    assert t % 8 == 0 and t % CHUNK_LEN == 0, "T must be a multiple of 8 and CHUNK_LEN"
    assert b % BATCH_BLOCK == 0, "B must be a multiple of BATCH_BLOCK"
    nb = b // BATCH_BLOCK
    mb = BATCH_BLOCK * t                                  # rows per grid step

    y2 = y.reshape(b * t, d).astype(jnp.float32)
    keep2 = keep_mask.reshape(b * t, 1).astype(jnp.float32)
    pe_block = jnp.tile(pe.astype(jnp.float32), (BATCH_BLOCK, 1))   # (mb, d)

    weights = (params['wqkv'], params['bqkv'], params['wo'], params['bo'],
               params['ln1_g'], params['ln1_b'],
               params['w1'], params['b1'], params['w2'], params['b2'],
               params['ln2_g'], params['ln2_b'],
               params['dec_w'], params['dec_b'])

    out_pad = params['dec_w'].shape[-1]

    in_specs = ([pl.BlockSpec((mb, d), lambda i: (i, 0)),     # y  (batch block / step)
                 pl.BlockSpec((mb, 1), lambda i: (i, 0)),     # keep mask
                 pl.BlockSpec((mb, d), lambda i: (0, 0))]     # positional encoding
                + [_full_block_spec(w) for w in weights])     # grid-invariant weights

    # Advisory cost estimate for XLA scheduling around the fused call.
    hd = d // NHEAD
    matmul_flops = NLAYERS * b * t * (2 * d * 3 * d + 2 * d * d + 4 * d * NHID)
    attn_flops = NLAYERS * b * NHEAD * (4 * t * t * hd)
    dec_flops = b * t * 2 * d * out_pad
    transcendentals = NLAYERS * b * NHEAD * (t * t + t)
    bytes_accessed = (y2.size * 4 + keep2.size * 4 + pe_block.size * 4
                      + sum(int(w.size) * w.dtype.itemsize for w in weights)
                      + b * t * out_pad * 4)
    cost = pl.CostEstimate(flops=int(matmul_flops + attn_flops + dec_flops),
                           transcendentals=int(transcendentals),
                           bytes_accessed=int(bytes_accessed))

    kern = functools.partial(fused_lm_kernel, nlayers=NLAYERS, nhead=NHEAD,
                             bb=BATCH_BLOCK, t=t)
    out = pl.pallas_call(
        kern,
        out_shape=jax.ShapeDtypeStruct((b * t, out_pad), jnp.float32),
        grid=(nb,),
        in_specs=in_specs,
        out_specs=pl.BlockSpec((mb, out_pad), lambda i: (i, 0)),
        compiler_params=pltpu.CompilerParams(
            dimension_semantics=("parallel",),
            vmem_limit_bytes=64 * 1024 * 1024),
        cost_estimate=cost,
    )(y2, keep2, pe_block, *weights)
    return out.reshape(b, t, out_pad)[..., :OUT_FEATS]


# ------------------------------ param / glue ----------------------------------
def init_params(key):
    """Synthetic deterministic init.  MXU-fed weights stored bf16 with QKV fused
    into (L, D, 3D); biases / LayerNorm params stored f32 in broadcast-ready
    (1, D)-style shapes."""
    ks = jax.random.split(key, 5)

    def nrm(k, shape):
        return 0.02 * jax.random.normal(k, shape, jnp.float32)

    p = {
        # fused in-projection: columns [0:D]=Q, [D:2D]=K, [2D:3D]=V
        'wqkv': nrm(ks[0], (NLAYERS, D, 3 * D)).astype(jnp.bfloat16),
        'bqkv': jnp.zeros((NLAYERS, 1, 3 * D), jnp.float32),
        'wo':   nrm(ks[1], (NLAYERS, D, D)).astype(jnp.bfloat16),
        'bo':   jnp.zeros((NLAYERS, 1, D), jnp.float32),
        'ln1_g': jnp.ones((NLAYERS, 1, D), jnp.float32),
        'ln1_b': jnp.zeros((NLAYERS, 1, D), jnp.float32),
        'w1': nrm(ks[2], (NLAYERS, D, NHID)).astype(jnp.bfloat16),
        'b1': jnp.zeros((NLAYERS, 1, NHID), jnp.float32),
        'w2': nrm(ks[3], (NLAYERS, NHID, D)).astype(jnp.bfloat16),
        'b2': jnp.zeros((NLAYERS, 1, D), jnp.float32),
        'ln2_g': jnp.ones((NLAYERS, 1, D), jnp.float32),
        'ln2_b': jnp.zeros((NLAYERS, 1, D), jnp.float32),
    }
    dec_w = nrm(ks[4], (D, OUT_FEATS))
    dec_w = jnp.pad(dec_w, ((0, 0), (0, OUT_PAD - OUT_FEATS)))   # lane-dense store
    p['dec_w'] = dec_w.astype(jnp.bfloat16)
    p['dec_b'] = jnp.zeros((1, OUT_PAD), jnp.float32)
    return p


def positional_encoding(t, d):
    pos = jnp.arange(t, dtype=jnp.float32)[:, None]
    i = jnp.arange(0, d, 2, dtype=jnp.float32)[None, :]
    div = jnp.exp(-math.log(10000.0) * i / d)
    pe = jnp.zeros((t, d), jnp.float32)
    pe = pe.at[:, 0::2].set(jnp.sin(pos * div))
    pe = pe.at[:, 1::2].set(jnp.cos(pos * div))
    return pe


def sample_chunk_mask(key, b, t, chunk_len, mask_percent):
    # TODO(synk): exact torch RNG chunk selection of TransformerLM.mask_src is
    # not reproducible; we deterministically sample masked chunks with
    # probability `mask_percent` using jax.random instead.
    n_chunks = t // chunk_len
    masked_chunks = jax.random.bernoulli(key, mask_percent, (b, n_chunks))
    masked = jnp.repeat(masked_chunks, chunk_len, axis=-1)        # (B, T) True = masked
    keep = (~masked).astype(jnp.float32)[..., None]               # (B, T, 1)
    return keep, masked


def late_lm_g_forward(x_audio, y, params, *, sample_flag=False,
                      token_duration=None, mask_key=None):
    """Mirrors LateLM_G.forward(x, y, **kwargs).  x_audio is unused (late fusion LM)."""
    del x_audio
    if sample_flag:
        # TODO(synk): int(...) mirrors the .item() host sync in the PyTorch code.
        t_len = int(jnp.sum(token_duration, axis=-1).reshape(-1)[0])
        y = y.reshape(-1, t_len, y.shape[-1])

    internal_losses = []
    b, t, d = y.shape
    keep_mask, masked_bool = sample_chunk_mask(mask_key, b, t, CHUNK_LEN, MASK_PERCENT)
    pe = positional_encoding(t, d)

    y_cap = fused_forward(y, keep_mask, pe, params)

    if sample_flag:
        y_cap = y_cap.reshape(1, -1, y_cap.shape[-1])

    # src_mask_loss: mask of MLM-masked positions, returned for the outer loss.
    return y_cap, internal_losses, dict(src_mask_loss=masked_bool)


# ----------------------------------- main -------------------------------------
if __name__ == "__main__":
    key = jax.random.PRNGKey(0)
    k_x, k_y, k_p, k_m = jax.random.split(key, 4)

    x = jax.random.normal(k_x, (B, T, AUDIO_F), jnp.float32)   # audio (unused)
    y = jax.random.normal(k_y, (B, T, D), jnp.float32)         # text/pose embedding
    params = init_params(k_p)

    y_cap, internal_losses, aux = late_lm_g_forward(
        x, y, params, sample_flag=False, mask_key=k_m)

    y_cap = jax.block_until_ready(y_cap)
    assert y_cap.shape == (B, T, OUT_FEATS)
    assert y_cap.dtype == jnp.float32
    assert bool(jnp.all(jnp.isfinite(y_cap)))
    print("KERNEL_OK")
</pallas_src>

<mosaic_0001>
module attributes {stable_mosaic.version = 11 : i64} {
  func.func @fused_lm_kernel(%arg0: i32, %arg1: memref<16x32xf32, #tpu.memory_space<vmem>>, %arg2: memref<16x1xf32, #tpu.memory_space<vmem>>, %arg3: memref<16x32xf32, #tpu.memory_space<vmem>>, %arg4: memref<2x32x96xbf16, #tpu.memory_space<vmem>>, %arg5: memref<2x1x96xf32, #tpu.memory_space<vmem>>, %arg6: memref<2x32x32xbf16, #tpu.memory_space<vmem>>, %arg7: memref<2x1x32xf32, #tpu.memory_space<vmem>>, %arg8: memref<2x1x32xf32, #tpu.memory_space<vmem>>, %arg9: memref<2x1x32xf32, #tpu.memory_space<vmem>>, %arg10: memref<2x32x64xbf16, #tpu.memory_space<vmem>>, %arg11: memref<2x1x64xf32, #tpu.memory_space<vmem>>, %arg12: memref<2x64x32xbf16, #tpu.memory_space<vmem>>, %arg13: memref<2x1x32xf32, #tpu.memory_space<vmem>>, %arg14: memref<2x1x32xf32, #tpu.memory_space<vmem>>, %arg15: memref<2x1x32xf32, #tpu.memory_space<vmem>>, %arg16: memref<32x128xbf16, #tpu.memory_space<vmem>>, %arg17: memref<1x128xf32, #tpu.memory_space<vmem>>, %arg18: memref<16x128xf32, #tpu.memory_space<vmem>>) attributes {dimension_semantics = [#tpu.dimension_semantics<parallel>], iteration_bounds = array<i64: 2>, scalar_prefetch = 0 : i64, scratch_operands = 0 : i64, tpu.core_type = #tpu.core_type<tc>, window_params = [{transform_indices = @transform_0, window_bounds = array<i64: 16, 32>}, {transform_indices = @transform_1, window_bounds = array<i64: 16, 1>}, {pipeline_mode = #tpu.pipeline_mode<synchronous>, transform_indices = @transform_2, window_bounds = array<i64: 16, 32>}, {pipeline_mode = #tpu.pipeline_mode<synchronous>, transform_indices = @transform_3, window_bounds = array<i64: 2, 32, 96>}, {pipeline_mode = #tpu.pipeline_mode<synchronous>, transform_indices = @transform_4, window_bounds = array<i64: 2, 1, 96>}, {pipeline_mode = #tpu.pipeline_mode<synchronous>, transform_indices = @transform_5, window_bounds = array<i64: 2, 32, 32>}, {pipeline_mode = #tpu.pipeline_mode<synchronous>, transform_indices = @transform_6, window_bounds = array<i64: 2, 1, 32>}, {pipeline_mode = #tpu.pipeline_mode<synchronous>, transform_indices = @transform_7, window_bounds = array<i64: 2, 1, 32>}, {pipeline_mode = #tpu.pipeline_mode<synchronous>, transform_indices = @transform_8, window_bounds = array<i64: 2, 1, 32>}, {pipeline_mode = #tpu.pipeline_mode<synchronous>, transform_indices = @transform_9, window_bounds = array<i64: 2, 32, 64>}, {pipeline_mode = #tpu.pipeline_mode<synchronous>, transform_indices = @transform_10, window_bounds = array<i64: 2, 1, 64>}, {pipeline_mode = #tpu.pipeline_mode<synchronous>, transform_indices = @transform_11, window_bounds = array<i64: 2, 64, 32>}, {pipeline_mode = #tpu.pipeline_mode<synchronous>, transform_indices = @transform_12, window_bounds = array<i64: 2, 1, 32>}, {pipeline_mode = #tpu.pipeline_mode<synchronous>, transform_indices = @transform_13, window_bounds = array<i64: 2, 1, 32>}, {pipeline_mode = #tpu.pipeline_mode<synchronous>, transform_indices = @transform_14, window_bounds = array<i64: 2, 1, 32>}, {pipeline_mode = #tpu.pipeline_mode<synchronous>, transform_indices = @transform_15, window_bounds = array<i64: 32, 128>}, {pipeline_mode = #tpu.pipeline_mode<synchronous>, transform_indices = @transform_16, window_bounds = array<i64: 1, 128>}, {transform_indices = @transform_17, window_bounds = array<i64: 16, 128>}]} {
    %c0 = arith.constant 0 : index
    %c0_0 = arith.constant 0 : index
    %0 = vector.load %arg1[%c0, %c0_0] : memref<16x32xf32, #tpu.memory_space<vmem>>, vector<16x32xf32>
    %c0_1 = arith.constant 0 : index
    %c0_2 = arith.constant 0 : index
    %1 = vector.load %arg2[%c0_1, %c0_2] : memref<16x1xf32, #tpu.memory_space<vmem>>, vector<16x1xf32>
    %2 = vector.broadcast %1 : vector<16x1xf32> to vector<16x32xf32>
    %3 = arith.mulf %0, %2 : vector<16x32xf32>
    %cst = arith.constant 5.65685415 : f32
    %4 = vector.broadcast %cst : f32 to vector<16x32xf32>
    %5 = arith.mulf %3, %4 : vector<16x32xf32>
    %c0_3 = arith.constant 0 : index
    %c0_4 = arith.constant 0 : index
    %6 = vector.load %arg3[%c0_3, %c0_4] : memref<16x32xf32, #tpu.memory_space<vmem>>, vector<16x32xf32>
    %7 = arith.addf %5, %6 : vector<16x32xf32>
    %8 = arith.truncf %7 : vector<16x32xf32> to vector<16x32xbf16>
    %c0_5 = arith.constant 0 : index
    %c0_6 = arith.constant 0 : index
    %c0_7 = arith.constant 0 : index
    %9 = vector.load %arg4[%c0_5, %c0_6, %c0_7] : memref<2x32x96xbf16, #tpu.memory_space<vmem>>, vector<1x32x96xbf16>
    %10 = vector.shape_cast %9 : vector<1x32x96xbf16> to vector<32x96xbf16>
    %cst_8 = arith.constant dense<0.000000e+00> : vector<16x96xf32>
    %11 = tpu.matmul %8, %10, %cst_8 {dimension_numbers = #tpu.dot_dimension_numbers<[1], [0], [0], [1], [0, 0, 1, 1], [], []>} : vector<16x32xbf16>, vector<32x96xbf16>, vector<16x96xf32> -> vector<16x96xf32>
    %c0_9 = arith.constant 0 : index
    %c0_10 = arith.constant 0 : index
    %c0_11 = arith.constant 0 : index
    %12 = vector.load %arg5[%c0_9, %c0_10, %c0_11] : memref<2x1x96xf32, #tpu.memory_space<vmem>>, vector<1x1x96xf32>
    %13 = vector.shape_cast %12 : vector<1x1x96xf32> to vector<1x96xf32>
    %14 = vector.broadcast %13 : vector<1x96xf32> to vector<16x96xf32>
    %15 = arith.addf %11, %14 : vector<16x96xf32>
    %16 = vector.extract_strided_slice %15 {offsets = [0, 0], sizes = [16, 32], strides = [1, 1]} : vector<16x96xf32> to vector<16x32xf32>
    %cst_12 = arith.constant 2.500000e-01 : f32
    %17 = vector.broadcast %cst_12 : f32 to vector<16x32xf32>
    %18 = arith.mulf %16, %17 : vector<16x32xf32>
    %19 = vector.extract_strided_slice %15 {offsets = [0, 32], sizes = [16, 32], strides = [1, 1]} : vector<16x96xf32> to vector<16x32xf32>
    %20 = vector.extract_strided_slice %15 {offsets = [0, 64], sizes = [16, 32], strides = [1, 1]} : vector<16x96xf32> to vector<16x32xf32>
    %21 = vector.extract_strided_slice %18 {offsets = [0, 0], sizes = [8, 16], strides = [1, 1]} : vector<16x32xf32> to vector<8x16xf32>
    %22 = arith.truncf %21 : vector<8x16xf32> to vector<8x16xbf16>
    %23 = vector.extract_strided_slice %19 {offsets = [0, 0], sizes = [8, 16], strides = [1, 1]} : vector<16x32xf32> to vector<8x16xf32>
    %24 = arith.truncf %23 : vector<8x16xf32> to vector<8x16xbf16>
    %25 = vector.extract_strided_slice %20 {offsets = [0, 0], sizes = [8, 16], strides = [1, 1]} : vector<16x32xf32> to vector<8x16xf32>
    %26 = arith.truncf %25 : vector<8x16xf32> to vector<8x16xbf16>
    %27 = tpu.transpose %24, [1, 0] : vector<8x16xbf16> -> vector<16x8xbf16>
    %cst_13 = arith.constant dense<0.000000e+00> : vector<8x8xf32>
    %28 = tpu.matmul %22, %27, %cst_13 {dimension_numbers = #tpu.dot_dimension_numbers<[1], [0], [0], [1], [0, 0, 1, 1], [], []>} : vector<8x16xbf16>, vector<16x8xbf16>, vector<8x8xf32> -> vector<8x8xf32>
    %cst_14 = arith.constant dense<0xFF800000> : vector<8xf32>
    %29 = vector.multi_reduction <maximumf>, %28, %cst_14 [1] : vector<8x8xf32> to vector<8xf32>
    %30 = vector.shape_cast %29 : vector<8xf32> to vector<8x1xf32>
    %31 = vector.broadcast %30 : vector<8x1xf32> to vector<8x8xf32>
    %32 = arith.subf %28, %31 : vector<8x8xf32>
    %33 = math.exp %32 : vector<8x8xf32>
    %cst_15 = arith.constant dense<0.000000e+00> : vector<8xf32>
    %34 = vector.multi_reduction <add>, %33, %cst_15 [1] : vector<8x8xf32> to vector<8xf32>
    %35 = vector.shape_cast %34 : vector<8xf32> to vector<8x1xf32>
    %36 = tpu.reciprocal %35 {approx = true} : vector<8x1xf32> -> vector<8x1xf32>
    %37 = vector.broadcast %36 : vector<8x1xf32> to vector<8x8xf32>
    %38 = arith.mulf %33, %37 : vector<8x8xf32>
    %39 = arith.truncf %38 : vector<8x8xf32> to vector<8x8xbf16>
    %cst_16 = arith.constant dense<0.000000e+00> : vector<8x16xf32>
    %40 = tpu.matmul %39, %26, %cst_16 {dimension_numbers = #tpu.dot_dimension_numbers<[1], [0], [0], [1], [0, 0, 1, 1], [], []>} : vector<8x8xbf16>, vector<8x16xbf16>, vector<8x16xf32> -> vector<8x16xf32>
    %41 = vector.extract_strided_slice %18 {offsets = [0, 16], sizes = [8, 16], strides = [1, 1]} : vector<16x32xf32> to vector<8x16xf32>
    %42 = arith.truncf %41 : vector<8x16xf32> to vector<8x16xbf16>
    %43 = vector.extract_strided_slice %19 {offsets = [0, 16], sizes = [8, 16], strides = [1, 1]} : vector<16x32xf32> to vector<8x16xf32>
    %44 = arith.truncf %43 : vector<8x16xf32> to vector<8x16xbf16>
    %45 = vector.extract_strided_slice %20 {offsets = [0, 16], sizes = [8, 16], strides = [1, 1]} : vector<16x32xf32> to vector<8x16xf32>
    %46 = arith.truncf %45 : vector<8x16xf32> to vector<8x16xbf16>
    %47 = tpu.transpose %44, [1, 0] : vector<8x16xbf16> -> vector<16x8xbf16>
    %cst_17 = arith.constant dense<0.000000e+00> : vector<8x8xf32>
    %48 = tpu.matmul %42, %47, %cst_17 {dimension_numbers = #tpu.dot_dimension_numbers<[1], [0], [0], [1], [0, 0, 1, 1], [], []>} : vector<8x16xbf16>, vector<16x8xbf16>, vector<8x8xf32> -> vector<8x8xf32>
    %cst_18 = arith.constant dense<0xFF800000> : vector<8xf32>
    %49 = vector.multi_reduction <maximumf>, %48, %cst_18 [1] : vector<8x8xf32> to vector<8xf32>
    %50 = vector.shape_cast %49 : vector<8xf32> to vector<8x1xf32>
    %51 = vector.broadcast %50 : vector<8x1xf32> to vector<8x8xf32>
    %52 = arith.subf %48, %51 : vector<8x8xf32>
    %53 = math.exp %52 : vector<8x8xf32>
    %cst_19 = arith.constant dense<0.000000e+00> : vector<8xf32>
    %54 = vector.multi_reduction <add>, %53, %cst_19 [1] : vector<8x8xf32> to vector<8xf32>
    %55 = vector.shape_cast %54 : vector<8xf32> to vector<8x1xf32>
    %56 = tpu.reciprocal %55 {approx = true} : vector<8x1xf32> -> vector<8x1xf32>
    %57 = vector.broadcast %56 : vector<8x1xf32> to vector<8x8xf32>
    %58 = arith.mulf %53, %57 : vector<8x8xf32>
    %59 = arith.truncf %58 : vector<8x8xf32> to vector<8x8xbf16>
    %cst_20 = arith.constant dense<0.000000e+00> : vector<8x16xf32>
    %60 = tpu.matmul %59, %46, %cst_20 {dimension_numbers = #tpu.dot_dimension_numbers<[1], [0], [0], [1], [0, 0, 1, 1], [], []>} : vector<8x8xbf16>, vector<8x16xbf16>, vector<8x16xf32> -> vector<8x16xf32>
    %61 = tpu.concatenate %40, %60 in 1 : vector<8x16xf32>, vector<8x16xf32> -> vector<8x32xf32>
    %62 = vector.extract_strided_slice %18 {offsets = [8, 0], sizes = [8, 16], strides = [1, 1]} : vector<16x32xf32> to vector<8x16xf32>
    %63 = arith.truncf %62 : vector<8x16xf32> to vector<8x16xbf16>
    %64 = vector.extract_strided_slice %19 {offsets = [8, 0], sizes = [8, 16], strides = [1, 1]} : vector<16x32xf32> to vector<8x16xf32>
    %65 = arith.truncf %64 : vector<8x16xf32> to vector<8x16xbf16>
    %66 = vector.extract_strided_slice %20 {offsets = [8, 0], sizes = [8, 16], strides = [1, 1]} : vector<16x32xf32> to vector<8x16xf32>
    %67 = arith.truncf %66 : vector<8x16xf32> to vector<8x16xbf16>
    %68 = tpu.transpose %65, [1, 0] : vector<8x16xbf16> -> vector<16x8xbf16>
    %cst_21 = arith.constant dense<0.000000e+00> : vector<8x8xf32>
    %69 = tpu.matmul %63, %68, %cst_21 {dimension_numbers = #tpu.dot_dimension_numbers<[1], [0], [0], [1], [0, 0, 1, 1], [], []>} : vector<8x16xbf16>, vector<16x8xbf16>, vector<8x8xf32> -> vector<8x8xf32>
    %cst_22 = arith.constant dense<0xFF800000> : vector<8xf32>
    %70 = vector.multi_reduction <maximumf>, %69, %cst_22 [1] : vector<8x8xf32> to vector<8xf32>
    %71 = vector.shape_cast %70 : vector<8xf32> to vector<8x1xf32>
    %72 = vector.broadcast %71 : vector<8x1xf32> to vector<8x8xf32>
    %73 = arith.subf %69, %72 : vector<8x8xf32>
    %74 = math.exp %73 : vector<8x8xf32>
    %cst_23 = arith.constant dense<0.000000e+00> : vector<8xf32>
    %75 = vector.multi_reduction <add>, %74, %cst_23 [1] : vector<8x8xf32> to vector<8xf32>
    %76 = vector.shape_cast %75 : vector<8xf32> to vector<8x1xf32>
    %77 = tpu.reciprocal %76 {approx = true} : vector<8x1xf32> -> vector<8x1xf32>
    %78 = vector.broadcast %77 : vector<8x1xf32> to vector<8x8xf32>
    %79 = arith.mulf %74, %78 : vector<8x8xf32>
    %80 = arith.truncf %79 : vector<8x8xf32> to vector<8x8xbf16>
    %cst_24 = arith.constant dense<0.000000e+00> : vector<8x16xf32>
    %81 = tpu.matmul %80, %67, %cst_24 {dimension_numbers = #tpu.dot_dimension_numbers<[1], [0], [0], [1], [0, 0, 1, 1], [], []>} : vector<8x8xbf16>, vector<8x16xbf16>, vector<8x16xf32> -> vector<8x16xf32>
    %82 = vector.extract_strided_slice %18 {offsets = [8, 16], sizes = [8, 16], strides = [1, 1]} : vector<16x32xf32> to vector<8x16xf32>
    %83 = arith.truncf %82 : vector<8x16xf32> to vector<8x16xbf16>
    %84 = vector.extract_strided_slice %19 {offsets = [8, 16], sizes = [8, 16], strides = [1, 1]} : vector<16x32xf32> to vector<8x16xf32>
    %85 = arith.truncf %84 : vector<8x16xf32> to vector<8x16xbf16>
    %86 = vector.extract_strided_slice %20 {offsets = [8, 16], sizes = [8, 16], strides = [1, 1]} : vector<16x32xf32> to vector<8x16xf32>
    %87 = arith.truncf %86 : vector<8x16xf32> to vector<8x16xbf16>
    %88 = tpu.transpose %85, [1, 0] : vector<8x16xbf16> -> vector<16x8xbf16>
    %cst_25 = arith.constant dense<0.000000e+00> : vector<8x8xf32>
    %89 = tpu.matmul %83, %88, %cst_25 {dimension_numbers = #tpu.dot_dimension_numbers<[1], [0], [0], [1], [0, 0, 1, 1], [], []>} : vector<8x16xbf16>, vector<16x8xbf16>, vector<8x8xf32> -> vector<8x8xf32>
    %cst_26 = arith.constant dense<0xFF800000> : vector<8xf32>
    %90 = vector.multi_reduction <maximumf>, %89, %cst_26 [1] : vector<8x8xf32> to vector<8xf32>
    %91 = vector.shape_cast %90 : vector<8xf32> to vector<8x1xf32>
    %92 = vector.broadcast %91 : vector<8x1xf32> to vector<8x8xf32>
    %93 = arith.subf %89, %92 : vector<8x8xf32>
    %94 = math.exp %93 : vector<8x8xf32>
    %cst_27 = arith.constant dense<0.000000e+00> : vector<8xf32>
    %95 = vector.multi_reduction <add>, %94, %cst_27 [1] : vector<8x8xf32> to vector<8xf32>
    %96 = vector.shape_cast %95 : vector<8xf32> to vector<8x1xf32>
    %97 = tpu.reciprocal %96 {approx = true} : vector<8x1xf32> -> vector<8x1xf32>
    %98 = vector.broadcast %97 : vector<8x1xf32> to vector<8x8xf32>
    %99 = arith.mulf %94, %98 : vector<8x8xf32>
    %100 = arith.truncf %99 : vector<8x8xf32> to vector<8x8xbf16>
    %cst_28 = arith.constant dense<0.000000e+00> : vector<8x16xf32>
    %101 = tpu.matmul %100, %87, %cst_28 {dimension_numbers = #tpu.dot_dimension_numbers<[1], [0], [0], [1], [0, 0, 1, 1], [], []>} : vector<8x8xbf16>, vector<8x16xbf16>, vector<8x16xf32> -> vector<8x16xf32>
    %102 = tpu.concatenate %81, %101 in 1 : vector<8x16xf32>, vector<8x16xf32> -> vector<8x32xf32>
    %103 = tpu.concatenate %61, %102 in 0 : vector<8x32xf32>, vector<8x32xf32> -> vector<16x32xf32>
    %104 = arith.truncf %103 : vector<16x32xf32> to vector<16x32xbf16>
    %c0_29 = arith.constant 0 : index
    %c0_30 = arith.constant 0 : index
    %c0_31 = arith.constant 0 : index
    %105 = vector.load %arg6[%c0_29, %c0_30, %c0_31] : memref<2x32x32xbf16, #tpu.memory_space<vmem>>, vector<1x32x32xbf16>
    %106 = vector.shape_cast %105 : vector<1x32x32xbf16> to vector<32x32xbf16>
    %cst_32 = arith.constant dense<0.000000e+00> : vector<16x32xf32>
    %107 = tpu.matmul %104, %106, %cst_32 {dimension_numbers = #tpu.dot_dimension_numbers<[1], [0], [0], [1], [0, 0, 1, 1], [], []>} : vector<16x32xbf16>, vector<32x32xbf16>, vector<16x32xf32> -> vector<16x32xf32>
    %c0_33 = arith.constant 0 : index
    %c0_34 = arith.constant 0 : index
    %c0_35 = arith.constant 0 : index
    %108 = vector.load %arg7[%c0_33, %c0_34, %c0_35] : memref<2x1x32xf32, #tpu.memory_space<vmem>>, vector<1x1x32xf32>
    %109 = vector.shape_cast %108 : vector<1x1x32xf32> to vector<1x32xf32>
    %110 = vector.broadcast %109 : vector<1x32xf32> to vector<16x32xf32>
    %111 = arith.addf %107, %110 : vector<16x32xf32>
    %112 = arith.addf %7, %111 : vector<16x32xf32>
    %c0_36 = arith.constant 0 : index
    %c0_37 = arith.constant 0 : index
    %c0_38 = arith.constant 0 : index
    %113 = vector.load %arg8[%c0_36, %c0_37, %c0_38] : memref<2x1x32xf32, #tpu.memory_space<vmem>>, vector<1x1x32xf32>
    %114 = vector.shape_cast %113 : vector<1x1x32xf32> to vector<1x32xf32>
    %c0_39 = arith.constant 0 : index
    %c0_40 = arith.constant 0 : index
    %c0_41 = arith.constant 0 : index
    %115 = vector.load %arg9[%c0_39, %c0_40, %c0_41] : memref<2x1x32xf32, #tpu.memory_space<vmem>>, vector<1x1x32xf32>
    %116 = vector.shape_cast %115 : vector<1x1x32xf32> to vector<1x32xf32>
    %cst_42 = arith.constant dense<0.000000e+00> : vector<16xf32>
    %117 = vector.multi_reduction <add>, %112, %cst_42 [1] : vector<16x32xf32> to vector<16xf32>
    %118 = vector.shape_cast %117 : vector<16xf32> to vector<16x1xf32>
    %cst_43 = arith.constant 3.200000e+01 : f32
    %119 = vector.broadcast %cst_43 : f32 to vector<16x1xf32>
    %120 = arith.divf %118, %119 : vector<16x1xf32>
    %121 = vector.broadcast %120 : vector<16x1xf32> to vector<16x32xf32>
    %122 = arith.subf %112, %121 : vector<16x32xf32>
    %123 = arith.mulf %122, %122 : vector<16x32xf32>
    %cst_44 = arith.constant dense<0.000000e+00> : vector<16xf32>
    %124 = vector.multi_reduction <add>, %123, %cst_44 [1] : vector<16x32xf32> to vector<16xf32>
    %125 = vector.shape_cast %124 : vector<16xf32> to vector<16x1xf32>
    %cst_45 = arith.constant 3.200000e+01 : f32
    %126 = vector.broadcast %cst_45 : f32 to vector<16x1xf32>
    %127 = arith.divf %125, %126 : vector<16x1xf32>
    %128 = vector.broadcast %120 : vector<16x1xf32> to vector<16x32xf32>
    %129 = arith.subf %112, %128 : vector<16x32xf32>
    %cst_46 = arith.constant 9.99999974E-6 : f32
    %130 = vector.broadcast %cst_46 : f32 to vector<16x1xf32>
    %131 = arith.addf %127, %130 : vector<16x1xf32>
    %132 = math.rsqrt %131 : vector<16x1xf32>
    %133 = vector.broadcast %132 : vector<16x1xf32> to vector<16x32xf32>
    %134 = arith.mulf %129, %133 : vector<16x32xf32>
    %135 = vector.broadcast %114 : vector<1x32xf32> to vector<16x32xf32>
    %136 = arith.mulf %134, %135 : vector<16x32xf32>
    %137 = vector.broadcast %116 : vector<1x32xf32> to vector<16x32xf32>
    %138 = arith.addf %136, %137 : vector<16x32xf32>
    %139 = arith.truncf %138 : vector<16x32xf32> to vector<16x32xbf16>
    %c0_47 = arith.constant 0 : index
    %c0_48 = arith.constant 0 : index
    %c0_49 = arith.constant 0 : index
    %140 = vector.load %arg10[%c0_47, %c0_48, %c0_49] : memref<2x32x64xbf16, #tpu.memory_space<vmem>>, vector<1x32x64xbf16>
    %141 = vector.shape_cast %140 : vector<1x32x64xbf16> to vector<32x64xbf16>
    %cst_50 = arith.constant dense<0.000000e+00> : vector<16x64xf32>
    %142 = tpu.matmul %139, %141, %cst_50 {dimension_numbers = #tpu.dot_dimension_numbers<[1], [0], [0], [1], [0, 0, 1, 1], [], []>} : vector<16x32xbf16>, vector<32x64xbf16>, vector<16x64xf32> -> vector<16x64xf32>
    %c0_51 = arith.constant 0 : index
    %c0_52 = arith.constant 0 : index
    %c0_53 = arith.constant 0 : index
    %143 = vector.load %arg11[%c0_51, %c0_52, %c0_53] : memref<2x1x64xf32, #tpu.memory_space<vmem>>, vector<1x1x64xf32>
    %144 = vector.shape_cast %143 : vector<1x1x64xf32> to vector<1x64xf32>
    %145 = vector.broadcast %144 : vector<1x64xf32> to vector<16x64xf32>
    %146 = arith.addf %142, %145 : vector<16x64xf32>
    %cst_54 = arith.constant 0.000000e+00 : f32
    %147 = vector.broadcast %cst_54 : f32 to vector<16x64xf32>
    %148 = arith.maximumf %146, %147 : vector<16x64xf32>
    %149 = arith.truncf %148 : vector<16x64xf32> to vector<16x64xbf16>
    %c0_55 = arith.constant 0 : index
    %c0_56 = arith.constant 0 : index
    %c0_57 = arith.constant 0 : index
    %150 = vector.load %arg12[%c0_55, %c0_56, %c0_57] : memref<2x64x32xbf16, #tpu.memory_space<vmem>>, vector<1x64x32xbf16>
    %151 = vector.shape_cast %150 : vector<1x64x32xbf16> to vector<64x32xbf16>
    %cst_58 = arith.constant dense<0.000000e+00> : vector<16x32xf32>
    %152 = tpu.matmul %149, %151, %cst_58 {dimension_numbers = #tpu.dot_dimension_numbers<[1], [0], [0], [1], [0, 0, 1, 1], [], []>} : vector<16x64xbf16>, vector<64x32xbf16>, vector<16x32xf32> -> vector<16x32xf32>
    %c0_59 = arith.constant 0 : index
    %c0_60 = arith.constant 0 : index
    %c0_61 = arith.constant 0 : index
    %153 = vector.load %arg13[%c0_59, %c0_60, %c0_61] : memref<2x1x32xf32, #tpu.memory_space<vmem>>, vector<1x1x32xf32>
    %154 = vector.shape_cast %153 : vector<1x1x32xf32> to vector<1x32xf32>
    %155 = vector.broadcast %154 : vector<1x32xf32> to vector<16x32xf32>
    %156 = arith.addf %152, %155 : vector<16x32xf32>
    %157 = arith.addf %138, %156 : vector<16x32xf32>
    %c0_62 = arith.constant 0 : index
    %c0_63 = arith.constant 0 : index
    %c0_64 = arith.constant 0 : index
    %158 = vector.load %arg14[%c0_62, %c0_63, %c0_64] : memref<2x1x32xf32, #tpu.memory_space<vmem>>, vector<1x1x32xf32>
    %159 = vector.shape_cast %158 : vector<1x1x32xf32> to vector<1x32xf32>
    %c0_65 = arith.constant 0 : index
    %c0_66 = arith.constant 0 : index
    %c0_67 = arith.constant 0 : index
    %160 = vector.load %arg15[%c0_65, %c0_66, %c0_67] : memref<2x1x32xf32, #tpu.memory_space<vmem>>, vector<1x1x32xf32>
    %161 = vector.shape_cast %160 : vector<1x1x32xf32> to vector<1x32xf32>
    %cst_68 = arith.constant dense<0.000000e+00> : vector<16xf32>
    %162 = vector.multi_reduction <add>, %157, %cst_68 [1] : vector<16x32xf32> to vector<16xf32>
    %163 = vector.shape_cast %162 : vector<16xf32> to vector<16x1xf32>
    %cst_69 = arith.constant 3.200000e+01 : f32
    %164 = vector.broadcast %cst_69 : f32 to vector<16x1xf32>
    %165 = arith.divf %163, %164 : vector<16x1xf32>
    %166 = vector.broadcast %165 : vector<16x1xf32> to vector<16x32xf32>
    %167 = arith.subf %157, %166 : vector<16x32xf32>
    %168 = arith.mulf %167, %167 : vector<16x32xf32>
    %cst_70 = arith.constant dense<0.000000e+00> : vector<16xf32>
    %169 = vector.multi_reduction <add>, %168, %cst_70 [1] : vector<16x32xf32> to vector<16xf32>
    %170 = vector.shape_cast %169 : vector<16xf32> to vector<16x1xf32>
    %cst_71 = arith.constant 3.200000e+01 : f32
    %171 = vector.broadcast %cst_71 : f32 to vector<16x1xf32>
    %172 = arith.divf %170, %171 : vector<16x1xf32>
    %173 = vector.broadcast %165 : vector<16x1xf32> to vector<16x32xf32>
    %174 = arith.subf %157, %173 : vector<16x32xf32>
    %cst_72 = arith.constant 9.99999974E-6 : f32
    %175 = vector.broadcast %cst_72 : f32 to vector<16x1xf32>
    %176 = arith.addf %172, %175 : vector<16x1xf32>
    %177 = math.rsqrt %176 : vector<16x1xf32>
    %178 = vector.broadcast %177 : vector<16x1xf32> to vector<16x32xf32>
    %179 = arith.mulf %174, %178 : vector<16x32xf32>
    %180 = vector.broadcast %159 : vector<1x32xf32> to vector<16x32xf32>
    %181 = arith.mulf %179, %180 : vector<16x32xf32>
    %182 = vector.broadcast %161 : vector<1x32xf32> to vector<16x32xf32>
    %183 = arith.addf %181, %182 : vector<16x32xf32>
    %184 = arith.truncf %183 : vector<16x32xf32> to vector<16x32xbf16>
    %c1 = arith.constant 1 : index
    %c0_73 = arith.constant 0 : index
    %c0_74 = arith.constant 0 : index
    %185 = vector.load %arg4[%c1, %c0_73, %c0_74] : memref<2x32x96xbf16, #tpu.memory_space<vmem>>, vector<1x32x96xbf16>
    %186 = vector.shape_cast %185 : vector<1x32x96xbf16> to vector<32x96xbf16>
    %cst_75 = arith.constant dense<0.000000e+00> : vector<16x96xf32>
    %187 = tpu.matmul %184, %186, %cst_75 {dimension_numbers = #tpu.dot_dimension_numbers<[1], [0], [0], [1], [0, 0, 1, 1], [], []>} : vector<16x32xbf16>, vector<32x96xbf16>, vector<16x96xf32> -> vector<16x96xf32>
    %c1_76 = arith.constant 1 : index
    %c0_77 = arith.constant 0 : index
    %c0_78 = arith.constant 0 : index
    %188 = vector.load %arg5[%c1_76, %c0_77, %c0_78] : memref<2x1x96xf32, #tpu.memory_space<vmem>>, vector<1x1x96xf32>
    %189 = vector.shape_cast %188 : vector<1x1x96xf32> to vector<1x96xf32>
    %190 = vector.broadcast %189 : vector<1x96xf32> to vector<16x96xf32>
    %191 = arith.addf %187, %190 : vector<16x96xf32>
    %192 = vector.extract_strided_slice %191 {offsets = [0, 0], sizes = [16, 32], strides = [1, 1]} : vector<16x96xf32> to vector<16x32xf32>
    %cst_79 = arith.constant 2.500000e-01 : f32
    %193 = vector.broadcast %cst_79 : f32 to vector<16x32xf32>
    %194 = arith.mulf %192, %193 : vector<16x32xf32>
    %195 = vector.extract_strided_slice %191 {offsets = [0, 32], sizes = [16, 32], strides = [1, 1]} : vector<16x96xf32> to vector<16x32xf32>
    %196 = vector.extract_strided_slice %191 {offsets = [0, 64], sizes = [16, 32], strides = [1, 1]} : vector<16x96xf32> to vector<16x32xf32>
    %197 = vector.extract_strided_slice %194 {offsets = [0, 0], sizes = [8, 16], strides = [1, 1]} : vector<16x32xf32> to vector<8x16xf32>
    %198 = arith.truncf %197 : vector<8x16xf32> to vector<8x16xbf16>
    %199 = vector.extract_strided_slice %195 {offsets = [0, 0], sizes = [8, 16], strides = [1, 1]} : vector<16x32xf32> to vector<8x16xf32>
    %200 = arith.truncf %199 : vector<8x16xf32> to vector<8x16xbf16>
    %201 = vector.extract_strided_slice %196 {offsets = [0, 0], sizes = [8, 16], strides = [1, 1]} : vector<16x32xf32> to vector<8x16xf32>
    %202 = arith.truncf %201 : vector<8x16xf32> to vector<8x16xbf16>
    %203 = tpu.transpose %200, [1, 0] : vector<8x16xbf16> -> vector<16x8xbf16>
    %cst_80 = arith.constant dense<0.000000e+00> : vector<8x8xf32>
    %204 = tpu.matmul %198, %203, %cst_80 {dimension_numbers = #tpu.dot_dimension_numbers<[1], [0], [0], [1], [0, 0, 1, 1], [], []>} : vector<8x16xbf16>, vector<16x8xbf16>, vector<8x8xf32> -> vector<8x8xf32>
    %cst_81 = arith.constant dense<0xFF800000> : vector<8xf32>
    %205 = vector.multi_reduction <maximumf>, %204, %cst_81 [1] : vector<8x8xf32> to vector<8xf32>
    %206 = vector.shape_cast %205 : vector<8xf32> to vector<8x1xf32>
    %207 = vector.broadcast %206 : vector<8x1xf32> to vector<8x8xf32>
    %208 = arith.subf %204, %207 : vector<8x8xf32>
    %209 = math.exp %208 : vector<8x8xf32>
    %cst_82 = arith.constant dense<0.000000e+00> : vector<8xf32>
    %210 = vector.multi_reduction <add>, %209, %cst_82 [1] : vector<8x8xf32> to vector<8xf32>
    %211 = vector.shape_cast %210 : vector<8xf32> to vector<8x1xf32>
    %212 = tpu.reciprocal %211 {approx = true} : vector<8x1xf32> -> vector<8x1xf32>
    %213 = vector.broadcast %212 : vector<8x1xf32> to vector<8x8xf32>
    %214 = arith.mulf %209, %213 : vector<8x8xf32>
    %215 = arith.truncf %214 : vector<8x8xf32> to vector<8x8xbf16>
    %cst_83 = arith.constant dense<0.000000e+00> : vector<8x16xf32>
    %216 = tpu.matmul %215, %202, %cst_83 {dimension_numbers = #tpu.dot_dimension_numbers<[1], [0], [0], [1], [0, 0, 1, 1], [], []>} : vector<8x8xbf16>, vector<8x16xbf16>, vector<8x16xf32> -> vector<8x16xf32>
    %217 = vector.extract_strided_slice %194 {offsets = [0, 16], sizes = [8, 16], strides = [1, 1]} : vector<16x32xf32> to vector<8x16xf32>
    %218 = arith.truncf %217 : vector<8x16xf32> to vector<8x16xbf16>
    %219 = vector.extract_strided_slice %195 {offsets = [0, 16], sizes = [8, 16], strides = [1, 1]} : vector<16x32xf32> to vector<8x16xf32>
    %220 = arith.truncf %219 : vector<8x16xf32> to vector<8x16xbf16>
    %221 = vector.extract_strided_slice %196 {offsets = [0, 16], sizes = [8, 16], strides = [1, 1]} : vector<16x32xf32> to vector<8x16xf32>
    %222 = arith.truncf %221 : vector<8x16xf32> to vector<8x16xbf16>
    %223 = tpu.transpose %220, [1, 0] : vector<8x16xbf16> -> vector<16x8xbf16>
    %cst_84 = arith.constant dense<0.000000e+00> : vector<8x8xf32>
    %224 = tpu.matmul %218, %223, %cst_84 {dimension_numbers = #tpu.dot_dimension_numbers<[1], [0], [0], [1], [0, 0, 1, 1], [], []>} : vector<8x16xbf16>, vector<16x8xbf16>, vector<8x8xf32> -> vector<8x8xf32>
    %cst_85 = arith.constant dense<0xFF800000> : vector<8xf32>
    %225 = vector.multi_reduction <maximumf>, %224, %cst_85 [1] : vector<8x8xf32> to vector<8xf32>
    %226 = vector.shape_cast %225 : vector<8xf32> to vector<8x1xf32>
    %227 = vector.broadcast %226 : vector<8x1xf32> to vector<8x8xf32>
    %228 = arith.subf %224, %227 : vector<8x8xf32>
    %229 = math.exp %228 : vector<8x8xf32>
    %cst_86 = arith.constant dense<0.000000e+00> : vector<8xf32>
    %230 = vector.multi_reduction <add>, %229, %cst_86 [1] : vector<8x8xf32> to vector<8xf32>
    %231 = vector.shape_cast %230 : vector<8xf32> to vector<8x1xf32>
    %232 = tpu.reciprocal %231 {approx = true} : vector<8x1xf32> -> vector<8x1xf32>
    %233 = vector.broadcast %232 : vector<8x1xf32> to vector<8x8xf32>
    %234 = arith.mulf %229, %233 : vector<8x8xf32>
    %235 = arith.truncf %234 : vector<8x8xf32> to vector<8x8xbf16>
    %cst_87 = arith.constant dense<0.000000e+00> : vector<8x16xf32>
    %236 = tpu.matmul %235, %222, %cst_87 {dimension_numbers = #tpu.dot_dimension_numbers<[1], [0], [0], [1], [0, 0, 1, 1], [], []>} : vector<8x8xbf16>, vector<8x16xbf16>, vector<8x16xf32> -> vector<8x16xf32>
    %237 = tpu.concatenate %216, %236 in 1 : vector<8x16xf32>, vector<8x16xf32> -> vector<8x32xf32>
    %238 = vector.extract_strided_slice %194 {offsets = [8, 0], sizes = [8, 16], strides = [1, 1]} : vector<16x32xf32> to vector<8x16xf32>
    %239 = arith.truncf %238 : vector<8x16xf32> to vector<8x16xbf16>
    %240 = vector.extract_strided_slice %195 {offsets = [8, 0], sizes = [8, 16], strides = [1, 1]} : vector<16x32xf32> to vector<8x16xf32>
    %241 = arith.truncf %240 : vector<8x16xf32> to vector<8x16xbf16>
    %242 = vector.extract_strided_slice %196 {offsets = [8, 0], sizes = [8, 16], strides = [1, 1]} : vector<16x32xf32> to vector<8x16xf32>
    %243 = arith.truncf %242 : vector<8x16xf32> to vector<8x16xbf16>
    %244 = tpu.transpose %241, [1, 0] : vector<8x16xbf16> -> vector<16x8xbf16>
    %cst_88 = arith.constant dense<0.000000e+00> : vector<8x8xf32>
    %245 = tpu.matmul %239, %244, %cst_88 {dimension_numbers = #tpu.dot_dimension_numbers<[1], [0], [0], [1], [0, 0, 1, 1], [], []>} : vector<8x16xbf16>, vector<16x8xbf16>, vector<8x8xf32> -> vector<8x8xf32>
    %cst_89 = arith.constant dense<0xFF800000> : vector<8xf32>
    %246 = vector.multi_reduction <maximumf>, %245, %cst_89 [1] : vector<8x8xf32> to vector<8xf32>
    %247 = vector.shape_cast %246 : vector<8xf32> to vector<8x1xf32>
    %248 = vector.broadcast %247 : vector<8x1xf32> to vector<8x8xf32>
    %249 = arith.subf %245, %248 : vector<8x8xf32>
    %250 = math.exp %249 : vector<8x8xf32>
    %cst_90 = arith.constant dense<0.000000e+00> : vector<8xf32>
    %251 = vector.multi_reduction <add>, %250, %cst_90 [1] : vector<8x8xf32> to vector<8xf32>
    %252 = vector.shape_cast %251 : vector<8xf32> to vector<8x1xf32>
    %253 = tpu.reciprocal %252 {approx = true} : vector<8x1xf32> -> vector<8x1xf32>
    %254 = vector.broadcast %253 : vector<8x1xf32> to vector<8x8xf32>
    %255 = arith.mulf %250, %254 : vector<8x8xf32>
    %256 = arith.truncf %255 : vector<8x8xf32> to vector<8x8xbf16>
    %cst_91 = arith.constant dense<0.000000e+00> : vector<8x16xf32>
    %257 = tpu.matmul %256, %243, %cst_91 {dimension_numbers = #tpu.dot_dimension_numbers<[1], [0], [0], [1], [0, 0, 1, 1], [], []>} : vector<8x8xbf16>, vector<8x16xbf16>, vector<8x16xf32> -> vector<8x16xf32>
    %258 = vector.extract_strided_slice %194 {offsets = [8, 16], sizes = [8, 16], strides = [1, 1]} : vector<16x32xf32> to vector<8x16xf32>
    %259 = arith.truncf %258 : vector<8x16xf32> to vector<8x16xbf16>
    %260 = vector.extract_strided_slice %195 {offsets = [8, 16], sizes = [8, 16], strides = [1, 1]} : vector<16x32xf32> to vector<8x16xf32>
    %261 = arith.truncf %260 : vector<8x16xf32> to vector<8x16xbf16>
    %262 = vector.extract_strided_slice %196 {offsets = [8, 16], sizes = [8, 16], strides = [1, 1]} : vector<16x32xf32> to vector<8x16xf32>
    %263 = arith.truncf %262 : vector<8x16xf32> to vector<8x16xbf16>
    %264 = tpu.transpose %261, [1, 0] : vector<8x16xbf16> -> vector<16x8xbf16>
    %cst_92 = arith.constant dense<0.000000e+00> : vector<8x8xf32>
    %265 = tpu.matmul %259, %264, %cst_92 {dimension_numbers = #tpu.dot_dimension_numbers<[1], [0], [0], [1], [0, 0, 1, 1], [], []>} : vector<8x16xbf16>, vector<16x8xbf16>, vector<8x8xf32> -> vector<8x8xf32>
    %cst_93 = arith.constant dense<0xFF800000> : vector<8xf32>
    %266 = vector.multi_reduction <maximumf>, %265, %cst_93 [1] : vector<8x8xf32> to vector<8xf32>
    %267 = vector.shape_cast %266 : vector<8xf32> to vector<8x1xf32>
    %268 = vector.broadcast %267 : vector<8x1xf32> to vector<8x8xf32>
    %269 = arith.subf %265, %268 : vector<8x8xf32>
    %270 = math.exp %269 : vector<8x8xf32>
    %cst_94 = arith.constant dense<0.000000e+00> : vector<8xf32>
    %271 = vector.multi_reduction <add>, %270, %cst_94 [1] : vector<8x8xf32> to vector<8xf32>
    %272 = vector.shape_cast %271 : vector<8xf32> to vector<8x1xf32>
    %273 = tpu.reciprocal %272 {approx = true} : vector<8x1xf32> -> vector<8x1xf32>
    %274 = vector.broadcast %273 : vector<8x1xf32> to vector<8x8xf32>
    %275 = arith.mulf %270, %274 : vector<8x8xf32>
    %276 = arith.truncf %275 : vector<8x8xf32> to vector<8x8xbf16>
    %cst_95 = arith.constant dense<0.000000e+00> : vector<8x16xf32>
    %277 = tpu.matmul %276, %263, %cst_95 {dimension_numbers = #tpu.dot_dimension_numbers<[1], [0], [0], [1], [0, 0, 1, 1], [], []>} : vector<8x8xbf16>, vector<8x16xbf16>, vector<8x16xf32> -> vector<8x16xf32>
    %278 = tpu.concatenate %257, %277 in 1 : vector<8x16xf32>, vector<8x16xf32> -> vector<8x32xf32>
    %279 = tpu.concatenate %237, %278 in 0 : vector<8x32xf32>, vector<8x32xf32> -> vector<16x32xf32>
    %280 = arith.truncf %279 : vector<16x32xf32> to vector<16x32xbf16>
    %c1_96 = arith.constant 1 : index
    %c0_97 = arith.constant 0 : index
    %c0_98 = arith.constant 0 : index
    %281 = vector.load %arg6[%c1_96, %c0_97, %c0_98] : memref<2x32x32xbf16, #tpu.memory_space<vmem>>, vector<1x32x32xbf16>
    %282 = vector.shape_cast %281 : vector<1x32x32xbf16> to vector<32x32xbf16>
    %cst_99 = arith.constant dense<0.000000e+00> : vector<16x32xf32>
    %283 = tpu.matmul %280, %282, %cst_99 {dimension_numbers = #tpu.dot_dimension_numbers<[1], [0], [0], [1], [0, 0, 1, 1], [], []>} : vector<16x32xbf16>, vector<32x32xbf16>, vector<16x32xf32> -> vector<16x32xf32>
    %c1_100 = arith.constant 1 : index
    %c0_101 = arith.constant 0 : index
    %c0_102 = arith.constant 0 : index
    %284 = vector.load %arg7[%c1_100, %c0_101, %c0_102] : memref<2x1x32xf32, #tpu.memory_space<vmem>>, vector<1x1x32xf32>
    %285 = vector.shape_cast %284 : vector<1x1x32xf32> to vector<1x32xf32>
    %286 = vector.broadcast %285 : vector<1x32xf32> to vector<16x32xf32>
    %287 = arith.addf %283, %286 : vector<16x32xf32>
    %288 = arith.addf %183, %287 : vector<16x32xf32>
    %c1_103 = arith.constant 1 : index
    %c0_104 = arith.constant 0 : index
    %c0_105 = arith.constant 0 : index
    %289 = vector.load %arg8[%c1_103, %c0_104, %c0_105] : memref<2x1x32xf32, #tpu.memory_space<vmem>>, vector<1x1x32xf32>
    %290 = vector.shape_cast %289 : vector<1x1x32xf32> to vector<1x32xf32>
    %c1_106 = arith.constant 1 : index
    %c0_107 = arith.constant 0 : index
    %c0_108 = arith.constant 0 : index
    %291 = vector.load %arg9[%c1_106, %c0_107, %c0_108] : memref<2x1x32xf32, #tpu.memory_space<vmem>>, vector<1x1x32xf32>
    %292 = vector.shape_cast %291 : vector<1x1x32xf32> to vector<1x32xf32>
    %cst_109 = arith.constant dense<0.000000e+00> : vector<16xf32>
    %293 = vector.multi_reduction <add>, %288, %cst_109 [1] : vector<16x32xf32> to vector<16xf32>
    %294 = vector.shape_cast %293 : vector<16xf32> to vector<16x1xf32>
    %cst_110 = arith.constant 3.200000e+01 : f32
    %295 = vector.broadcast %cst_110 : f32 to vector<16x1xf32>
    %296 = arith.divf %294, %295 : vector<16x1xf32>
    %297 = vector.broadcast %296 : vector<16x1xf32> to vector<16x32xf32>
    %298 = arith.subf %288, %297 : vector<16x32xf32>
    %299 = arith.mulf %298, %298 : vector<16x32xf32>
    %cst_111 = arith.constant dense<0.000000e+00> : vector<16xf32>
    %300 = vector.multi_reduction <add>, %299, %cst_111 [1] : vector<16x32xf32> to vector<16xf32>
    %301 = vector.shape_cast %300 : vector<16xf32> to vector<16x1xf32>
    %cst_112 = arith.constant 3.200000e+01 : f32
    %302 = vector.broadcast %cst_112 : f32 to vector<16x1xf32>
    %303 = arith.divf %301, %302 : vector<16x1xf32>
    %304 = vector.broadcast %296 : vector<16x1xf32> to vector<16x32xf32>
    %305 = arith.subf %288, %304 : vector<16x32xf32>
    %cst_113 = arith.constant 9.99999974E-6 : f32
    %306 = vector.broadcast %cst_113 : f32 to vector<16x1xf32>
    %307 = arith.addf %303, %306 : vector<16x1xf32>
    %308 = math.rsqrt %307 : vector<16x1xf32>
    %309 = vector.broadcast %308 : vector<16x1xf32> to vector<16x32xf32>
    %310 = arith.mulf %305, %309 : vector<16x32xf32>
    %311 = vector.broadcast %290 : vector<1x32xf32> to vector<16x32xf32>
    %312 = arith.mulf %310, %311 : vector<16x32xf32>
    %313 = vector.broadcast %292 : vector<1x32xf32> to vector<16x32xf32>
    %314 = arith.addf %312, %313 : vector<16x32xf32>
    %315 = arith.truncf %314 : vector<16x32xf32> to vector<16x32xbf16>
    %c1_114 = arith.constant 1 : index
    %c0_115 = arith.constant 0 : index
    %c0_116 = arith.constant 0 : index
    %316 = vector.load %arg10[%c1_114, %c0_115, %c0_116] : memref<2x32x64xbf16, #tpu.memory_space<vmem>>, vector<1x32x64xbf16>
    %317 = vector.shape_cast %316 : vector<1x32x64xbf16> to vector<32x64xbf16>
    %cst_117 = arith.constant dense<0.000000e+00> : vector<16x64xf32>
    %318 = tpu.matmul %315, %317, %cst_117 {dimension_numbers = #tpu.dot_dimension_numbers<[1], [0], [0], [1], [0, 0, 1, 1], [], []>} : vector<16x32xbf16>, vector<32x64xbf16>, vector<16x64xf32> -> vector<16x64xf32>
    %c1_118 = arith.constant 1 : index
    %c0_119 = arith.constant 0 : index
    %c0_120 = arith.constant 0 : index
    %319 = vector.load %arg11[%c1_118, %c0_119, %c0_120] : memref<2x1x64xf32, #tpu.memory_space<vmem>>, vector<1x1x64xf32>
    %320 = vector.shape_cast %319 : vector<1x1x64xf32> to vector<1x64xf32>
    %321 = vector.broadcast %320 : vector<1x64xf32> to vector<16x64xf32>
    %322 = arith.addf %318, %321 : vector<16x64xf32>
    %cst_121 = arith.constant 0.000000e+00 : f32
    %323 = vector.broadcast %cst_121 : f32 to vector<16x64xf32>
    %324 = arith.maximumf %322, %323 : vector<16x64xf32>
    %325 = arith.truncf %324 : vector<16x64xf32> to vector<16x64xbf16>
    %c1_122 = arith.constant 1 : index
    %c0_123 = arith.constant 0 : index
    %c0_124 = arith.constant 0 : index
    %326 = vector.load %arg12[%c1_122, %c0_123, %c0_124] : memref<2x64x32xbf16, #tpu.memory_space<vmem>>, vector<1x64x32xbf16>
    %327 = vector.shape_cast %326 : vector<1x64x32xbf16> to vector<64x32xbf16>
    %cst_125 = arith.constant dense<0.000000e+00> : vector<16x32xf32>
    %328 = tpu.matmul %325, %327, %cst_125 {dimension_numbers = #tpu.dot_dimension_numbers<[1], [0], [0], [1], [0, 0, 1, 1], [], []>} : vector<16x64xbf16>, vector<64x32xbf16>, vector<16x32xf32> -> vector<16x32xf32>
    %c1_126 = arith.constant 1 : index
    %c0_127 = arith.constant 0 : index
    %c0_128 = arith.constant 0 : index
    %329 = vector.load %arg13[%c1_126, %c0_127, %c0_128] : memref<2x1x32xf32, #tpu.memory_space<vmem>>, vector<1x1x32xf32>
    %330 = vector.shape_cast %329 : vector<1x1x32xf32> to vector<1x32xf32>
    %331 = vector.broadcast %330 : vector<1x32xf32> to vector<16x32xf32>
    %332 = arith.addf %328, %331 : vector<16x32xf32>
    %333 = arith.addf %314, %332 : vector<16x32xf32>
    %c1_129 = arith.constant 1 : index
    %c0_130 = arith.constant 0 : index
    %c0_131 = arith.constant 0 : index
    %334 = vector.load %arg14[%c1_129, %c0_130, %c0_131] : memref<2x1x32xf32, #tpu.memory_space<vmem>>, vector<1x1x32xf32>
    %335 = vector.shape_cast %334 : vector<1x1x32xf32> to vector<1x32xf32>
    %c1_132 = arith.constant 1 : index
    %c0_133 = arith.constant 0 : index
    %c0_134 = arith.constant 0 : index
    %336 = vector.load %arg15[%c1_132, %c0_133, %c0_134] : memref<2x1x32xf32, #tpu.memory_space<vmem>>, vector<1x1x32xf32>
    %337 = vector.shape_cast %336 : vector<1x1x32xf32> to vector<1x32xf32>
    %cst_135 = arith.constant dense<0.000000e+00> : vector<16xf32>
    %338 = vector.multi_reduction <add>, %333, %cst_135 [1] : vector<16x32xf32> to vector<16xf32>
    %339 = vector.shape_cast %338 : vector<16xf32> to vector<16x1xf32>
    %cst_136 = arith.constant 3.200000e+01 : f32
    %340 = vector.broadcast %cst_136 : f32 to vector<16x1xf32>
    %341 = arith.divf %339, %340 : vector<16x1xf32>
    %342 = vector.broadcast %341 : vector<16x1xf32> to vector<16x32xf32>
    %343 = arith.subf %333, %342 : vector<16x32xf32>
    %344 = arith.mulf %343, %343 : vector<16x32xf32>
    %cst_137 = arith.constant dense<0.000000e+00> : vector<16xf32>
    %345 = vector.multi_reduction <add>, %344, %cst_137 [1] : vector<16x32xf32> to vector<16xf32>
    %346 = vector.shape_cast %345 : vector<16xf32> to vector<16x1xf32>
    %cst_138 = arith.constant 3.200000e+01 : f32
    %347 = vector.broadcast %cst_138 : f32 to vector<16x1xf32>
    %348 = arith.divf %346, %347 : vector<16x1xf32>
    %349 = vector.broadcast %341 : vector<16x1xf32> to vector<16x32xf32>
    %350 = arith.subf %333, %349 : vector<16x32xf32>
    %cst_139 = arith.constant 9.99999974E-6 : f32
    %351 = vector.broadcast %cst_139 : f32 to vector<16x1xf32>
    %352 = arith.addf %348, %351 : vector<16x1xf32>
    %353 = math.rsqrt %352 : vector<16x1xf32>
    %354 = vector.broadcast %353 : vector<16x1xf32> to vector<16x32xf32>
    %355 = arith.mulf %350, %354 : vector<16x32xf32>
    %356 = vector.broadcast %335 : vector<1x32xf32> to vector<16x32xf32>
    %357 = arith.mulf %355, %356 : vector<16x32xf32>
    %358 = vector.broadcast %337 : vector<1x32xf32> to vector<16x32xf32>
    %359 = arith.addf %357, %358 : vector<16x32xf32>
    %360 = arith.truncf %359 : vector<16x32xf32> to vector<16x32xbf16>
    %c0_140 = arith.constant 0 : index
    %c0_141 = arith.constant 0 : index
    %361 = vector.load %arg16[%c0_140, %c0_141] : memref<32x128xbf16, #tpu.memory_space<vmem>>, vector<32x128xbf16>
    %cst_142 = arith.constant dense<0.000000e+00> : vector<16x128xf32>
    %362 = tpu.matmul %360, %361, %cst_142 {dimension_numbers = #tpu.dot_dimension_numbers<[1], [0], [0], [1], [0, 0, 1, 1], [], []>} : vector<16x32xbf16>, vector<32x128xbf16>, vector<16x128xf32> -> vector<16x128xf32>
    %c0_143 = arith.constant 0 : index
    %c0_144 = arith.constant 0 : index
    %363 = vector.load %arg17[%c0_143, %c0_144] : memref<1x128xf32, #tpu.memory_space<vmem>>, vector<1x128xf32>
    %364 = vector.broadcast %363 : vector<1x128xf32> to vector<16x128xf32>
    %365 = arith.addf %362, %364 : vector<16x128xf32>
    %c0_145 = arith.constant 0 : index
    %c0_146 = arith.constant 0 : index
    %366 = vector.load %arg18[%c0_145, %c0_146] : memref<16x128xf32, #tpu.memory_space<vmem>>, vector<16x128xf32>
    tpu.vector_store %arg18[%c0_145, %c0_146], %365 {strides = array<i32>} : memref<16x128xf32, #tpu.memory_space<vmem>>, vector<16x128xf32>,
    return
  }
  func.func @transform_0(%arg0: i32) -> (i32, i32) {
    %c0_i32 = arith.constant 0 : i32
    %c0_i32_0 = arith.constant 0 : i32
    return %arg0, %c0_i32 : i32, i32
  }
  func.func @transform_1(%arg0: i32) -> (i32, i32) {
    %c0_i32 = arith.constant 0 : i32
    %c0_i32_0 = arith.constant 0 : i32
    return %arg0, %c0_i32 : i32, i32
  }
  func.func @transform_2(%arg0: i32) -> (i32, i32) {
    %c0_i32 = arith.constant 0 : i32
    %c0_i32_0 = arith.constant 0 : i32
    %c0_i32_1 = arith.constant 0 : i32
    return %c0_i32, %c0_i32_0 : i32, i32
  }
  func.func @transform_3(%arg0: i32) -> (i32, i32, i32) {
    %c0_i32 = arith.constant 0 : i32
    %c0_i32_0 = arith.constant 0 : i32
    %c0_i32_1 = arith.constant 0 : i32
    %c0_i32_2 = arith.constant 0 : i32
    return %c0_i32, %c0_i32_0, %c0_i32_1 : i32, i32, i32
  }
  func.func @transform_4(%arg0: i32) -> (i32, i32, i32) {
    %c0_i32 = arith.constant 0 : i32
    %c0_i32_0 = arith.constant 0 : i32
    %c0_i32_1 = arith.constant 0 : i32
    %c0_i32_2 = arith.constant 0 : i32
    return %c0_i32, %c0_i32_0, %c0_i32_1 : i32, i32, i32
  }
  func.func @transform_5(%arg0: i32) -> (i32, i32, i32) {
    %c0_i32 = arith.constant 0 : i32
    %c0_i32_0 = arith.constant 0 : i32
    %c0_i32_1 = arith.constant 0 : i32
    %c0_i32_2 = arith.constant 0 : i32
    return %c0_i32, %c0_i32_0, %c0_i32_1 : i32, i32, i32
  }
  func.func @transform_6(%arg0: i32) -> (i32, i32, i32) {
    %c0_i32 = arith.constant 0 : i32
    %c0_i32_0 = arith.constant 0 : i32
    %c0_i32_1 = arith.constant 0 : i32
    %c0_i32_2 = arith.constant 0 : i32
    return %c0_i32, %c0_i32_0, %c0_i32_1 : i32, i32, i32
  }
  func.func @transform_7(%arg0: i32) -> (i32, i32, i32) {
    %c0_i32 = arith.constant 0 : i32
    %c0_i32_0 = arith.constant 0 : i32
    %c0_i32_1 = arith.constant 0 : i32
    %c0_i32_2 = arith.constant 0 : i32
    return %c0_i32, %c0_i32_0, %c0_i32_1 : i32, i32, i32
  }
  func.func @transform_8(%arg0: i32) -> (i32, i32, i32) {
    %c0_i32 = arith.constant 0 : i32
    %c0_i32_0 = arith.constant 0 : i32
    %c0_i32_1 = arith.constant 0 : i32
    %c0_i32_2 = arith.constant 0 : i32
    return %c0_i32, %c0_i32_0, %c0_i32_1 : i32, i32, i32
  }
  func.func @transform_9(%arg0: i32) -> (i32, i32, i32) {
    %c0_i32 = arith.constant 0 : i32
    %c0_i32_0 = arith.constant 0 : i32
    %c0_i32_1 = arith.constant 0 : i32
    %c0_i32_2 = arith.constant 0 : i32
    return %c0_i32, %c0_i32_0, %c0_i32_1 : i32, i32, i32
  }
  func.func @transform_10(%arg0: i32) -> (i32, i32, i32) {
    %c0_i32 = arith.constant 0 : i32
    %c0_i32_0 = arith.constant 0 : i32
    %c0_i32_1 = arith.constant 0 : i32
    %c0_i32_2 = arith.constant 0 : i32
    return %c0_i32, %c0_i32_0, %c0_i32_1 : i32, i32, i32
  }
  func.func @transform_11(%arg0: i32) -> (i32, i32, i32) {
    %c0_i32 = arith.constant 0 : i32
    %c0_i32_0 = arith.constant 0 : i32
    %c0_i32_1 = arith.constant 0 : i32
    %c0_i32_2 = arith.constant 0 : i32
    return %c0_i32, %c0_i32_0, %c0_i32_1 : i32, i32, i32
  }
  func.func @transform_12(%arg0: i32) -> (i32, i32, i32) {
    %c0_i32 = arith.constant 0 : i32
    %c0_i32_0 = arith.constant 0 : i32
    %c0_i32_1 = arith.constant 0 : i32
    %c0_i32_2 = arith.constant 0 : i32
    return %c0_i32, %c0_i32_0, %c0_i32_1 : i32, i32, i32
  }
  func.func @transform_13(%arg0: i32) -> (i32, i32, i32) {
    %c0_i32 = arith.constant 0 : i32
    %c0_i32_0 = arith.constant 0 : i32
    %c0_i32_1 = arith.constant 0 : i32
    %c0_i32_2 = arith.constant 0 : i32
    return %c0_i32, %c0_i32_0, %c0_i32_1 : i32, i32, i32
  }
  func.func @transform_14(%arg0: i32) -> (i32, i32, i32) {
    %c0_i32 = arith.constant 0 : i32
    %c0_i32_0 = arith.constant 0 : i32
    %c0_i32_1 = arith.constant 0 : i32
    %c0_i32_2 = arith.constant 0 : i32
    return %c0_i32, %c0_i32_0, %c0_i32_1 : i32, i32, i32
  }
  func.func @transform_15(%arg0: i32) -> (i32, i32) {
    %c0_i32 = arith.constant 0 : i32
    %c0_i32_0 = arith.constant 0 : i32
    %c0_i32_1 = arith.constant 0 : i32
    return %c0_i32, %c0_i32_0 : i32, i32
  }
  func.func @transform_16(%arg0: i32) -> (i32, i32) {
    %c0_i32 = arith.constant 0 : i32
    %c0_i32_0 = arith.constant 0 : i32
    %c0_i32_1 = arith.constant 0 : i32
    return %c0_i32, %c0_i32_0 : i32, i32
  }
  func.func @transform_17(%arg0: i32) -> (i32, i32) {
    %c0_i32 = arith.constant 0 : i32
    %c0_i32_0 = arith.constant 0 : i32
    return %arg0, %c0_i32 : i32, i32
  }
}

</mosaic_0001>

<bundles_post_ra>
// kernel: tpu_custom_call.1
= control target key start
LH: loop header
LB: loop body
LE: loop exit
PB: predicated region body
PF: predicated region fallthrough
CT: control target
= control target key end

     0   :  { %s3927_s0 = inlined_call_operand.vmem [shape: f32[32,32], index: 0, kind: input, shape index: {}]   ;;  %s3928_s1 = inlined_call_operand.vmem [shape: f32[32,1], index: 1, kind: input, shape index: {}]   ;;  %s3929_s2 = inlined_call_operand.hbm [shape: f32[16,32], index: 2, kind: input, shape index: {}]   ;;  %s3930_s3 = inlined_call_operand.vmem [shape: bf16[2,32,96], index: 3, kind: input, shape index: {}]   ;;  %s3931_s4 = inlined_call_operand.hbm [shape: f32[2,1,96], index: 4, kind: input, shape index: {}]   ;;  %s3932_s5 = inlined_call_operand.vmem [shape: bf16[2,32,32], index: 5, kind: input, shape index: {}]   ;;  %s3933_s6 = inlined_call_operand.hbm [shape: f32[2,1,32], index: 6, kind: input, shape index: {}]   ;;  %s3934_s7 = inlined_call_operand.hbm [shape: f32[2,1,32], index: 7, kind: input, shape index: {}]   ;;  %s3935_s8 = inlined_call_operand.hbm [shape: f32[2,1,32], index: 8, kind: input, shape index: {}]   ;;  %s3936_s9 = inlined_call_operand.vmem [shape: bf16[2,32,64], index: 9, kind: input, shape index: {}]   ;;  %s3937_s10 = inlined_call_operand.vmem [shape: f32[2,1,64], index: 10, kind: input, shape index: {}]   ;;  %s3938_s11 = inlined_call_operand.vmem [shape: bf16[2,64,32], index: 11, kind: input, shape index: {}]   ;;  %s3939_s12 = inlined_call_operand.vmem [shape: f32[2,1,32], index: 12, kind: input, shape index: {}]   ;;  %s3940_s13 = inlined_call_operand.vmem [shape: f32[2,1,32], index: 13, kind: input, shape index: {}]   ;;  %s3941_s14 = inlined_call_operand.vmem [shape: f32[2,1,32], index: 14, kind: input, shape index: {}]   ;;  %s3942_s15 = inlined_call_operand.vmem [shape: bf16[32,128], index: 15, kind: input, shape index: {}]   ;;  %s3943_s16 = inlined_call_operand.vmem [shape: f32[1,128], index: 16, kind: input, shape index: {}]   ;;  %s3944_s17 = inlined_call_operand.hbm [shape: f32[32,128], index: 17, kind: output, shape index: {}]  }
   0x1   :  { %3957 = sst [smem:[#allocation22_spill]] %s3927_s0 }
   0x2   :  { %3958 = sst [smem:[#allocation23_spill]] %s3928_s1 }
   0x3   :  { %3959 = sst [smem:[#allocation24_spill]] %s3931_s4 }
   0x4   :  { %3960 = sst [smem:[#allocation25_spill]] %s3944_s17 }
   0x5   :  { %22 = vsyncpa [#allocation3], 0 }
   0x6   :  { %23 = vsyncpa [#allocation6], 0 }
   0x7   :  { %24 = vsyncpa [#allocation9], 0 }
   0x8   :  { %25 = vsyncpa [#allocation4], 0 }
   0x9   :  { %27 = vsyncpa [#allocation4 + $0x1], 0  ;;  %s3423_s24 = smov 0   ;;  %s3425_s25 = smov 0  }
   0xa   :  { %s3427_s26 = smov 0   ;;  %s3429_s27 = smov 0  }
   0xb LB: > { %3961 = sst [smem:[#allocation16_spill]] %s3298_s24  ;;  %s3444_s28 = sadd.s32 4294967295, %s3310_s27   ;;  %s3310_s27 = sphi %s3429_s27, %s3987_s27   ;;  %s3306_s26 = sphi %s3427_s26, %s3989_s26   ;;  %s3302_s25 = sphi %s3425_s25, %s3991_s25   ;;  %s3298_s24 = sphi %s3423_s24, %s3990_s24  }
   0xc   : > { %3962 = sst [smem:[#allocation17_spill]] %s3306_s26  ;;  %s2570_s29 = sadd.s32 4294967294, %s3310_s27  }
   0xd   : > { %3963 = sst [smem:[#allocation18_spill]] %s3310_s27  ;;  %s3448_s0 = sadd.s32 1, %s3310_s27  }
   0xe   : > { %3964 = sst [smem:[#allocation19_spill]] %s3448_s0  ;;  %s407_s30 = sadd.s32 1, %s3306_s26 }
   0xf   : > { %s404_s18 = ssub.s32 %s3310_s27, %s3448_s0  ;;  %p417_p0 = scmp.ne.s32.totalorder %s3306_s26, %s3302_s25 }
  0x10   : > { %p405_p1 = scmp.eq.s32.totalorder %s404_s18, 0  ;;  %p418_p2 = scmp.eq.s32.totalorder %s3444_s28, 1 }
  0x11   : > { %p423_p3 = scmp.ne.s32.totalorder %s3302_s25, %s3298_s24  ;;  %p424_p4 = scmp.eq.s32.totalorder %s2570_s29, 1 }
  0x12   : > { %s3459_s19 = scalar_select %p405_p1, %s3306_s26, %s407_s30  }
  0x13   : > { %p3461_p5 = por %p418_p2, %p417_p0  ;;  %p3465_p6 = por %p424_p4, %p423_p3 }
  0x14   : > { %3965 = sst [smem:[#allocation20_spill]] %s3459_s19  ;;  %p2571_p7 = scmp.ge.s32.totalorder %s3310_s27, 1 }
  0x15   : > { %s3967_s20 = scalar_select %p3465_p6, 1, 0 }
  0x16   : > { %p431_p8 = scmp.lt.s32.totalorder %s3310_s27, 3  ;;  %p3952_p9 = scmp.eq.s32.totalorder %s3444_s28, 0 }
  0x17   : > { %3968 = sst [smem:[#allocation21_spill]] %s3967_s20  ;;  %s3312_s22 = smov [#allocation5]  }
  0x18   : > { %p3472_p10 = pnand %p2571_p7, %p431_p8  ;;  %s459_s23 = sshll.u32 %s3312_s22, 4  ;;  %s460_s23 = int_to_ptr.vmem [resolvable:$true] %s459_s23 }
  0x19   : > { %s3313_s30 = smov [#allocation8]   ;;  %s3314_s19 = smov [#allocation2]  }
  0x1a   : > { %p2944_p11 = pneg %p3472_p10  ;;  %s488_s18 = sshll.u32 %s3313_s30, 4  ;;  %s489_s18 = int_to_ptr.vmem [resolvable:$true] %s488_s18 }
  0x1b   : > { %s443_s26 = sshll.u32 %s3314_s19, 4  ;;  %s3119_s22 = scalar_lea.vmem %s460_s23, 32  ;;  %s444_s26 = int_to_ptr.vmem [resolvable:$true] %s443_s26 }
  0x1c   : > { %p3480_p12 = pnand %p3952_p9, %p2944_p11  ;;  %p3120_p0 = scmp.ne.s32.totalorder %s460_s23, %s3119_s22 }
  0x1d   : > { %p3127_p3 = scmp.lt.s32.totalorder %s460_s23, %s460_s23  ;;  %p3128_p4 = scmp.lt.s32.totalorder %s3119_s22, %s3119_s22 }
  0x1e   : > { %p3486_p13 = pneg %p3480_p12 }
  0x1f   : > { %p3129_p7 = por %p3128_p4, %p3127_p3 }
  0x20   : > { %p3122_p1 = pnand %p3120_p0, %p3486_p13 }
  0x22   : > { %p3123_p2 = pneg %p3122_p1 }
  0x24   : > { %p3130_p8 = pnand %p3129_p7, %p3123_p2 }
  0x26   : > { %3133 = shalt.err (!%p3130_p8)
}
  0x27   : > { %s3953_s30 = smov 16   ;;  %s3955_s19 = smov 1  }
  0x28   : > { %s3972_s4 = sld [smem:[#allocation24_spill]]  ;;  %s3145_s27 = scalar_lea.vmem %s489_s18, 32 }
  0x29   : > { %p3146_p11 = scmp.ne.s32.totalorder %s489_s18, %s3145_s27  ;;  %p3153_p3 = scmp.lt.s32.totalorder %s489_s18, %s489_s18 }
  0x2a   : > { %p3154_p2 = scmp.lt.s32.totalorder %s3145_s27, %s3145_s27 }
  0x2b   : > { %p3148_p0 = pnand %p3146_p11, %p3486_p13 }
  0x2c   : > { %p3155_p4 = por %p3154_p2, %p3153_p3 }
  0x2d   : > { %p3149_p1 = pneg %p3148_p0 }
  0x2e   : > { %2950 = dma.hbm_to_vmem [thread:$0]  (!%p3480_p12), %s3972_s4, 32, %s460_s23, [#allocation6], %s3953_s30, %s3953_s30, %s3955_s19  }
  0x2f   : > { %p3156_p7 = pnand %p3155_p4, %p3149_p1 }
  0x31   : > { %3159 = shalt.err (!%p3156_p7)
}
  0x32   : > { %2956 = dma.hbm_to_vmem [thread:$0]  (!%p3480_p12), %s3934_s7, 32, %s489_s18, [#allocation9], %s3953_s30, %s3953_s30, %s3955_s19  }
  0x33   : > { %s3171_s24 = scalar_lea.vmem %s444_s26, 256  ;;  %p3179_p9 = scmp.lt.s32.totalorder %s444_s26, %s444_s26 }
  0x34   : > { %p3172_p8 = scmp.ne.s32.totalorder %s444_s26, %s3171_s24  ;;  %p3180_p3 = scmp.lt.s32.totalorder %s3171_s24, %s3171_s24 }
  0x36   : > { %p3174_p11 = pnand %p3172_p8, %p3486_p13  ;;  %p3181_p1 = por %p3180_p3, %p3179_p9 }
  0x38   : > { %p3175_p0 = pneg %p3174_p11 }
  0x3a   : > { %p3182_p2 = pnand %p3181_p1, %p3175_p0 }
  0x3c   : > { %3185 = shalt.err (!%p3182_p2)
}
  0x3d   : > { %s3317_s27 = smov 128   ;;  %s3318_s20 = smov 8  }
  0x3e   : > { %2947 = dma.hbm_to_vmem [thread:$0]  (!%p3480_p12), %s3929_s2, 256, %s444_s26, [#allocation3], %s3317_s27, %s3317_s27, %s3318_s20  }
  0x3f   : > { %s3319_s18 = smov [#allocation7]   ;;  %s3320_s30 = smov [#allocation10]  }
  0x40   : > { %s475_s22 = sshll.u32 %s3319_s18, 4  ;;  %s501_s19 = sshll.u32 %s3320_s30, 4  ;;  %s476_s22 = int_to_ptr.vmem [resolvable:$true] %s475_s22  ;;  %s502_s19 = int_to_ptr.vmem [resolvable:$true] %s501_s19 }
  0x41   : > { %s3197_s4 = scalar_lea.vmem %s476_s22, 32  ;;  %p3205_p8 = scmp.lt.s32.totalorder %s476_s22, %s476_s22 }
  0x42   : > { %p3198_p4 = scmp.ne.s32.totalorder %s476_s22, %s3197_s4  ;;  %p3206_p11 = scmp.lt.s32.totalorder %s3197_s4, %s3197_s4 }
  0x44   : > { %p3200_p9 = pnand %p3198_p4, %p3486_p13  ;;  %p3207_p0 = por %p3206_p11, %p3205_p8 }
  0x46   : > { %p3201_p7 = pneg %p3200_p9 }
  0x48   : > { %p3208_p3 = pnand %p3207_p0, %p3201_p7 }
  0x4a   : > { %3211 = shalt.err (!%p3208_p3)
}
  0x4b   : > { %s3973_s24 = smov 1   ;;  %s3974_s23 = smov 16  }
  0x4c   : > { %2953 = dma.hbm_to_vmem [thread:$0]  (!%p3480_p12), %s3933_s6, 32, %s476_s22, [#allocation6], %s3974_s23, %s3974_s23, %s3973_s24  }
  0x4d   : > { %s3223_s30 = scalar_lea.vmem %s502_s19, 32  ;;  %p3231_p9 = scmp.lt.s32.totalorder %s502_s19, %s502_s19 }
  0x4e   : > { %p3224_p1 = scmp.ne.s32.totalorder %s502_s19, %s3223_s30  ;;  %p3232_p8 = scmp.lt.s32.totalorder %s3223_s30, %s3223_s30 }
  0x50   : > { %p3226_p2 = pnand %p3224_p1, %p3486_p13  ;;  %p3233_p7 = por %p3232_p8, %p3231_p9 }
  0x52   : > { %p3227_p4 = pneg %p3226_p2 }
  0x54   : > { %p3234_p11 = pnand %p3233_p7, %p3227_p4 }
  0x56   : > { %3237 = shalt.err (!%p3234_p11)
}
  0x57   : > { %2959 = dma.hbm_to_vmem [thread:$0]  (!%p3480_p12), %s3935_s8, 32, %s502_s19, [#allocation9], %s3974_s23, %s3974_s23, %s3973_s24  }
  0x58   : > { %559 = sbr.rel (%p3472_p10) target bundleno = 5314 (0x14c2), region = 88  ;;  %p3975_p13 = scmp.eq.s32.totalorder (!%p3472_p10), %s3444_s28, 0 }
  0x5d   : > { %3281 = dma.done.wait (%p3975_p13), [#allocation3], 256   ;;  %p3976_p0 = pmov %p3975_p13 }
  0x5f   : > { %3283 = vsyncadd (%p3976_p0), [#allocation3], 4294967040  ;;  %p3977_p3 = pmov %p3976_p0 }
  0x60   : > { %p3978_p1 = pmov %p3976_p0 }
  0x61   : > { %3285 = dma.done.wait (%p3977_p3), [#allocation6], 64  }
  0x62   : > { %3287 = vsyncadd (%p3978_p1), [#allocation6], 4294967232  ;;  %p3979_p2 = pmov %p3976_p0 }
  0x63   : > { %p3980_p12 = pmov %p3976_p0 }
  0x64   : > { %3289 = dma.done.wait (%p3979_p2), [#allocation9], 64  }
  0x65   : > { %3291 = vsyncadd (%p3980_p12), [#allocation9], 4294967232  ;;  %s2585_s0 = sshll.u32 %s3444_s28, 1  ;;  %v3321_v0 = vmov 0   ;;  %s3981_s17 = sld [smem:[#allocation23_spill]]  ;;  %v3322_v3 = vmov 0.0  }
  0x66   : > { %3027 = vset.pattern.permute.xlu0 %v3321_v0  ;;  %p633_p10 = scmp.lt.s32.totalorder %s2585_s0, 3  ;;  %2746 = vmatprep.subr.bf16.mxu0 %v3322_v3  ;;  %v3038_v4 = vld [vmem:[%s3930_s3 + $0x8] sm:$0xff]   ;;  %v3039_v5 = vld [vmem:[%s3930_s3] sm:$0xff]   ;;  %vm3323_vm0 = vmmov 0   ;;  %s3982_s4 = sld [smem:[#allocation22_spill]]  ;;  %vm692_vm1 = vcmask 261120  }
  0x67   : > { %2754 = vmatprep.subr.bf16.mxu1 %v3322_v3  ;;  %2747 = vmatpush3.bf16.msra.mxu0 %v3038_v4  ;;  %v664_v13 = vld [vmem:[#allocation2] sm:$0xff]  ;;  %v665_v14 = vld [vmem:[#allocation2 + $0x8] sm:$0xff]  ;;  %v2589_v19 = vld [vmem:[#allocation5] ss:$0 sm:$0xff]  ;;  %s3326_s29 = smov 80   ;;  %vm744_vm2 = vcmask 130048  }
  0x68   : > { %s3993_s0 = smov (!%p633_p10, %s2585_s0), 3  ;;  %2748 = vmatprep.subr.bf16.mxu0 %v3322_v3  ;;  %2750 = vmatprep.mubr.msk.bf16.mxu0 %vm3323_vm0, %v3322_v3  ;;  %vm791_vm3 = vcmask 64512   ;;  %s3327_s19 = smov 64   ;;  %vm809_vm4 = vcmask 1043456   ;;  %vm1421_vm5 = vcmask 523264  }
  0x69   : > { %s2586_s21 = sshll.u32 %s3993_s0, 3  ;;  %2756 = vmatprep.mubr.msk.bf16.mxu1 %vm3323_vm0, %v3322_v3  ;;  %s3324_s0 = smov 96  }
  0x6a   : > { %s3329_s26 = smov 16   ;;  %s2682_s27 = sshll.u32 %s3444_s28, 8 }
  0x6b   : > { %s642_s18 = scalar_lea.vmem %s3981_s17, %s2586_s21  ;;  %2749 = vmatpush3.bf16.msra.mxu0 %v3039_v5  ;;  %s3328_s17 = smov 48  }
  0x6c   : > { %v648_v1 = vld [vmem:[%s642_s18] sm:$0xff]  ;;  %v649_v2 = vld [vmem:[%s642_s18 + $0x8] sm:$0xff]  ;;  %2760 = vmatprep.subr.bf16.mxu0 %v3322_v3  ;;  %s636_s20 = scalar_lea.vmem %s3982_s4, %s2586_s21  ;;  %s3325_s21 = smov 112  }
  0x6d   : > { %652 = vperm.xlu0 %3027, %v648_v1   ;;  %v646_v6 = vld [vmem:[%s636_s20] sm:$0xff]  ;;  %v647_v9 = vld [vmem:[%s636_s20 + $0x8] sm:$0xff]  ;;  %s3983_s20 = sld [smem:[#allocation25_spill]]  ;;  %s3330_s28 = smov [#allocation11]  }
  0x6e   : > { %s3242_s23 = sshll.u32 %s3330_s28, 4  ;;  %s3243_s23 = int_to_ptr.vmem [resolvable:$false] %s3242_s23 }
  0x71   : > { %657 = vperm.xlu0 %3027, %v649_v2  }
  0x73   : > { %s3885_s18 = scalar_lea.hbm %s3983_s20, %s2682_s27 }
  0xe8   : > { %v653_v7 = vpop.permute.xlu0 %652 }
  0xe9   : > { %v660_v8 = vmul.f32 %v653_v7, %v646_v6 }
  0xeb   : > { %v662_v11 = vmul.f32 5.656854, %v660_v8 }
  0xec   : > { %v658_v10 = vpop.permute.xlu0 %657 }
  0xed   : > { %v661_v12 = vmul.f32 %v658_v10, %v647_v9  ;;  %v3572_v16 = vadd.f32 %v664_v13, %v662_v11 }
  0xef   : > { %v663_v15 = vmul.f32 5.656854, %v661_v12 }
  0xf1   : > { %v3574_v17 = vadd.f32 %v665_v14, %v663_v15 }
  0xf3   : > { %v668_v18 = vpack.c.bf16 %v3574_v17, %v3572_v16 }
  0xf5   : > { %2751 = vmatmul.mubr.msk.bf16.vlgmr.msra.gmra.mxu0 %vm692_vm1, %v668_v18 }
  0xf6   : > { %2762 = vmatprep.mubr.msk.bf16.mxu0 %vm3323_vm0, %v3322_v3 }
 0x1b5   : > { %v730_v20 = vpop.f32.mrf.mxu0 }
 0x1b6   : > { %v731_v21 = vadd.f32 %v2589_v19, %v730_v20 }
 0x1b7   : > { %v2752_v22 = vpop.f32.mrf.mxu0 }
 0x1b8   : > { %v737_v23 = vmul.f32 0.25, %v731_v21  ;;  %v3581_v24 = vpack.c.bf16 %v731_v21, %v731_v21 }
 0x1b9   : > { %v733_v25 = vpop.f32.mrf.mxu0 }
 0x1ba   : > { %v739_v26 = vpack.c.bf16 %v737_v23, %v737_v23  ;;  %v734_v27 = vadd.f32 %v2589_v19, %v733_v25  ;;  %742 = vrot.lane.b32.xlu1 %v3581_v24, %s3324_s0 }
 0x1bb   : > { %v2753_v28 = vpop.f32.mrf.mxu0 }
 0x1bc   : > { %854 = vrot.lane.b32.xlu0 %v739_v26, %s3325_s21  ;;  %v3586_v29 = vpack.c.bf16 %v734_v27, %v734_v27  ;;  %v738_v30 = vmul.f32 0.25, %v734_v27 }
 0x1be   : > { %856 = vrot.lane.b32.xlu1 %v3581_v24, %s3326_s29  ;;  %v969_v31 = vpack.c.bf16 %v738_v30, %v738_v30 }
 0x1c0   : > { %1083 = vrot.lane.b32.xlu0 %v3586_v29, %s3326_s29 }
 0x1c2   : > { %972 = vrot.lane.b32.xlu1 %v3586_v29, %s3324_s0 }
 0x1c6   : > { %1081 = vrot.lane.b32.xlu1 %v969_v31, %s3325_s21 }
 0x22c   : > { %v743_v32 = vpop.permute.xlu1 %742 }
 0x22d   : > { %v749_v33 = vsel %vm744_vm2, %v743_v32, 0 }
 0x22e   : > { %2755 = vmatpush3.bf16.xpose.msra.mxu1 %v749_v33  ;;  %v855_v37 = vpop.permute.xlu0 %854 }
 0x22f   : > { %2766 = vmatprep.subr.bf16.mxu1 %v3322_v3 }
 0x230   : > { %v857_v34 = vpop.permute.xlu1 %856 }
 0x231   : > { %v862_v35 = vsel %vm744_vm2, %v857_v34, 0 }
 0x232   : > { %v1084_v39 = vpop.permute.xlu0 %1083 }
 0x233   : > { %v1089_v40 = vsel %vm744_vm2, %v1084_v39, 0 }
 0x234   : > { %v973_v36 = vpop.permute.xlu1 %972 }
 0x235   : > { %2757 = vmatmul.mubr.msk.bf16.vlgmr.msra.gmra.mxu1 %vm744_vm2, %v739_v26  ;;  %v978_v38 = vsel %vm744_vm2, %v973_v36, 0 }
 0x236   : > { %2767 = vmatpush3.bf16.xpose.msra.mxu1 %v862_v35  ;;  %2768 = vmatprep.mubr.msk.bf16.mxu1 %vm3323_vm0, %v3322_v3 }
 0x237   : > { %2778 = vmatprep.subr.bf16.mxu1 %v3322_v3 }
 0x238   : > { %v1082_v41 = vpop.permute.xlu1 %1081 }
 0x23d   : > { %2769 = vmatmul.mubr.msk.bf16.vlgmr.msra.gmra.mxu1 %vm744_vm2, %v855_v37 }
 0x23e   : > { %2779 = vmatpush3.bf16.xpose.msra.mxu1 %v978_v38  ;;  %2780 = vmatprep.mubr.msk.bf16.mxu1 %vm3323_vm0, %v3322_v3 }
 0x23f   : > { %2790 = vmatprep.subr.bf16.mxu1 %v3322_v3 }
 0x245   : > { %2781 = vmatmul.mubr.msk.bf16.vlgmr.msra.gmra.mxu1 %vm744_vm2, %v969_v31 }
 0x246   : > { %2791 = vmatpush3.bf16.xpose.msra.mxu1 %v1089_v40  ;;  %2792 = vmatprep.mubr.msk.bf16.mxu1 %vm3323_vm0, %v3322_v3 }
 0x247   : > { %2802 = vmatprep.subr.bf16.mxu1 %v3322_v3 }
 0x24d   : > { %2793 = vmatmul.mubr.msk.bf16.vlgmr.msra.gmra.mxu1 %vm744_vm2, %v1082_v41 }
 0x24e   : > { %2806 = vmatprep.mubr.msk.bf16.mxu1 %vm3323_vm0, %v3322_v3 }
 0x2f5   : > { %v785_v42 = vpop.f32.mrf.mxu1 }
 0x2f6   : > { %v792_v43 = vsel %vm791_vm3, %v785_v42, -inf }
 0x2f7   : > { %v2758_v44 = vpop.f32.mrf.mxu1  ;;  %793 = vmax.xlane.f32.xlu0 %v792_v43 }
 0x2f9   : > { %v788_v45 = vpop.f32.mrf.mxu1 }
 0x2fa   : > { %v3040_v45 = vld [vmem:[%s3932_s5 + $0x8] sm:$0xff]  }
 0x2fb   : > { %v2759_v46 = vpop.f32.mrf.mxu1  ;;  %2803 = vmatpush3.bf16.msra.mxu1 %v3040_v45 }
 0x2fc   : > { %2804 = vmatprep.subr.bf16.mxu1 %v3322_v3 }
 0x2fd   : > { %v898_v47 = vpop.f32.mrf.mxu1 }
 0x2fe   : > { %v904_v48 = vsel %vm791_vm3, %v898_v47, -inf }
 0x2ff   : > { %v2770_v49 = vpop.f32.mrf.mxu1  ;;  %905 = vmax.xlane.f32.xlu1 %v904_v48 }
 0x301   : > { %v901_v50 = vpop.f32.mrf.mxu1 }
 0x303   : > { %v2771_v51 = vpop.f32.mrf.mxu1 }
 0x305   : > { %v1014_v52 = vpop.f32.mrf.mxu1 }
 0x306   : > { %v1020_v53 = vsel %vm791_vm3, %v1014_v52, -inf }
 0x307   : > { %1021 = vmax.xlane.f32.xlu0 %v1020_v53  ;;  %v2782_v54 = vpop.f32.mrf.mxu1 }
 0x308   : > { %v3041_v54 = vld [vmem:[%s3932_s5] sm:$0xff]  }
 0x309   : > { %v1017_v55 = vpop.f32.mrf.mxu1  ;;  %2805 = vmatpush3.bf16.msra.mxu1 %v3041_v54 }
 0x30a   : > { %2818 = vmatprep.subr.bf16.mxu1 %v3322_v3 }
 0x30b   : > { %v2783_v56 = vpop.f32.mrf.mxu1 }
 0x30d   : > { %v1125_v57 = vpop.f32.mrf.mxu1 }
 0x30e   : > { %v1131_v58 = vsel %vm791_vm3, %v1125_v57, -inf }
 0x30f   : > { %1132 = vmax.xlane.f32.xlu0 %v1131_v58  ;;  %v2794_v59 = vpop.f32.mrf.mxu1 }
 0x311   : > { %v1128_v60 = vpop.f32.mrf.mxu1 }
 0x313   : > { %v2795_v61 = vpop.f32.mrf.mxu1 }
 0x380   : > { %v794_v62 = vpop.xlane.xlu0 %793 }
 0x381   : > { %v795_v63 = vsub.f32 %v785_v42, %v794_v62 }
 0x383   : > { %v796_v0 = vmul.f32 1.442695, %v795_v63 }
 0x385   : > { %3060 = vpow2.f32 %v796_v0 }
 0x388   : > { %v906_v1 = vpop.xlane.xlu1 %905 }
 0x389   : > { %v907_v2 = vsub.f32 %v898_v47, %v906_v1 }
 0x38b   : > { %v908_v4 = vmul.f32 1.442695, %v907_v2 }
 0x38d   : > { %3062 = vpow2.f32 %v908_v4 }
 0x390   : > { %v1022_v7 = vpop.xlane.xlu0 %1021 }
 0x391   : > { %v1023_v15 = vsub.f32 %v1014_v52, %v1022_v7  ;;  %v2601_v7 = vld [vmem:[#allocation7] ss:$0 sm:$0xff] }
 0x392   : > { %v3061_v5 = vpop.eup %3060 }
 0x393   : > { %v798_v6 = vsel %vm791_vm3, %v3061_v5, 0.0  ;;  %v1024_v18 = vmul.f32 1.442695, %v1023_v15 }
 0x394   : > { %799 = vadd.xlane.f32.xlu1 %v798_v6 }
 0x398   : > { %v1133_v8 = vpop.xlane.xlu0 %1132 }
 0x399   : > { %v1134_v9 = vsub.f32 %v1125_v57, %v1133_v8 }
 0x39a   : > { %v3063_v10 = vpop.eup %3062 }
 0x39b   : > { %v1135_v11 = vmul.f32 1.442695, %v1134_v9  ;;  %v910_v12 = vsel %vm791_vm3, %v3063_v10, 0.0 }
 0x39c   : > { %911 = vadd.xlane.f32.xlu0 %v910_v12 }
 0x39d   : > { %3064 = vpow2.f32 %v1135_v11 }
 0x39e   : > { %3066 = vpow2.f32 %v1024_v18 }
 0x3a5   : > { %804 = vrot.lane.b32.xlu1 %v3581_v24, %s3327_s19 }
 0x3aa   : > { %v3065_v13 = vpop.eup %3064 }
 0x3ab   : > { %v1137_v14 = vsel %vm791_vm3, %v3065_v13, 0.0  ;;  %v3067_v19 = vpop.eup %3066 }
 0x3ac   : > { %1138 = vadd.xlane.f32.xlu0 %v1137_v14  ;;  %v1026_v20 = vsel %vm791_vm3, %v3067_v19, 0.0 }
 0x3c2   : > { %916 = vrot.lane.b32.xlu0 %v3581_v24, %s3328_s17 }
 0x3c9   : > { %1027 = vadd.xlane.f32.xlu1 %v1026_v20 }
 0x3da   : > { %1032 = vrot.lane.b32.xlu1 %v3586_v29, %s3327_s19 }
 0x3de   : > { %1143 = vrot.lane.b32.xlu1 %v3586_v29, %s3328_s17 }
 0x41d   : > { %v800_v21 = vpop.xlane.xlu1 %799 }
 0x41e   : > { %3068 = vrcp.f32 %v800_v21 }
 0x421   : > { %v805_v22 = vpop.permute.xlu1 %804 }
 0x422   : > { %v811_v23 = vsel %vm809_vm4, %v805_v22, 0 }
 0x423   : > { %2761 = vmatpush3.bf16.msra.mxu0 %v811_v23 }
 0x424   : > { %2772 = vmatprep.subr.bf16.mxu0 %v3322_v3 }
 0x425   : > { %v912_v24 = vpop.xlane.xlu0 %911 }
 0x426   : > { %3070 = vrcp.f32 %v912_v24 }
 0x42b   : > { %v3069_v25 = vpop.eup %3068 }
 0x42c   : > { %v802_v26 = vmul.f32 %v3069_v25, %v3061_v5 }
 0x42e   : > { %v803_v27 = vpack.c.bf16 %v802_v26, %v802_v26 }
 0x430   : > { %2763 = vmatmul.mubr.msk.bf16.vlgmr.msra.gmra.mxu0 %vm791_vm3, %v803_v27 }
 0x431   : > { %2774 = vmatprep.mubr.msk.bf16.mxu0 %vm3323_vm0, %v3322_v3 }
 0x433   : > { %v3071_v28 = vpop.eup %3070 }
 0x434   : > { %v914_v30 = vmul.f32 %v3071_v28, %v3063_v10 }
 0x435   : > { %v1139_v29 = vpop.xlane.xlu0 %1138 }
 0x436   : > { %v915_v33 = vpack.c.bf16 %v914_v30, %v914_v30  ;;  %v3044_v30 = vld [vmem:[%s3938_s11 + $0x18] sm:$0xff]  }
 0x439   : > { %v917_v31 = vpop.permute.xlu0 %916 }
 0x43a   : > { %v922_v32 = vsel %vm809_vm4, %v917_v31, 0 }
 0x43b   : > { %2773 = vmatpush3.bf16.msra.mxu0 %v922_v32 }
 0x43c   : > { %2784 = vmatprep.subr.bf16.mxu0 %v3322_v3 }
 0x43e   : > { %2775 = vmatmul.mubr.msk.bf16.vlgmr.msra.gmra.mxu0 %vm791_vm3, %v915_v33 }
 0x43f   : > { %2786 = vmatprep.mubr.msk.bf16.mxu0 %vm3323_vm0, %v3322_v3 }
 0x452   : > { %v1028_v34 = vpop.xlane.xlu1 %1027 }
 0x453   : > { %3072 = vrcp.f32 %v1028_v34 }
 0x454   : > { %3074 = vrcp.f32 %v1139_v29  ;;  %v3043_v29 = vld [vmem:[%s3936_s9] sm:$0xff]  }
 0x456   : > { %v1033_v35 = vpop.permute.xlu1 %1032 }
 0x457   : > { %v1038_v36 = vsel %vm809_vm4, %v1033_v35, 0 }
 0x458   : > { %2785 = vmatpush3.bf16.msra.mxu0 %v1038_v36 }
 0x459   : > { %2796 = vmatprep.subr.bf16.mxu0 %v3322_v3 }
 0x45a   : > { %v1144_v39 = vpop.permute.xlu1 %1143 }
 0x45b   : > { %v1149_v42 = vsel %vm809_vm4, %v1144_v39, 0  ;;  %v2605_v39 = vld [vmem:[#allocation8] ss:$0 sm:$0xff] }
 0x460   : > { %v3073_v37 = vpop.eup %3072 }
 0x461   : > { %v1030_v38 = vmul.f32 %v3073_v37, %v3067_v19  ;;  %v3075_v41 = vpop.eup %3074 }
 0x462   : > { %v1141_v43 = vmul.f32 %v3075_v41, %v3065_v13 }
 0x463   : > { %v1031_v40 = vpack.c.bf16 %v1030_v38, %v1030_v38 }
 0x464   : > { %v1142_v44 = vpack.c.bf16 %v1141_v43, %v1141_v43  ;;  %v2606_v43 = vld [vmem:[#allocation10] ss:$0 sm:$0xff] }
 0x465   : > { %2787 = vmatmul.mubr.msk.bf16.vlgmr.msra.gmra.mxu0 %vm791_vm3, %v1031_v40 }
 0x466   : > { %2797 = vmatpush3.bf16.msra.mxu0 %v1149_v42  ;;  %2798 = vmatprep.mubr.msk.bf16.mxu0 %vm3323_vm0, %v3322_v3 }
 0x467   : > { %2810 = vmatprep.subr.bf16.mxu0 %v3322_v3 }
 0x46d   : > { %2799 = vmatmul.mubr.msk.bf16.vlgmr.msra.gmra.mxu0 %vm791_vm3, %v1142_v44 }
 0x46e   : > { %2814 = vmatprep.mubr.msk.bf16.mxu0 %vm3323_vm0, %v3322_v3 }
 0x4f0   : > { %v847_v46 = vpop.f32.mrf.mxu0 }
 0x4f2   : > { %v2764_v47 = vpop.f32.mrf.mxu0 }
 0x4f4   : > { %v850_v48 = vpop.f32.mrf.mxu0 }
 0x4f5   : > { %v3045_v48 = vld [vmem:[%s3938_s11 + $0x10] sm:$0xff]  }
 0x4f6   : > { %v2765_v49 = vpop.f32.mrf.mxu0 }
 0x4f7   : > { %v3046_v49 = vld [vmem:[%s3938_s11 + $0x8] sm:$0xff]  }
 0x4fe   : > { %v958_v50 = vpop.f32.mrf.mxu0 }
 0x500   : > { %v2776_v51 = vpop.f32.mrf.mxu0 }
 0x501   : > { %v2607_v51 = vld [vmem:[%s3937_s10] ss:$0 sm:$0xff] }
 0x502   : > { %v961_v52 = vpop.f32.mrf.mxu0 }
 0x504   : > { %v2777_v53 = vpop.f32.mrf.mxu0 }
 0x525   : > { %v1074_v55 = vpop.f32.mrf.mxu0 }
 0x527   : > { %v2788_v56 = vpop.f32.mrf.mxu0 }
 0x529   : > { %v1077_v57 = vpop.f32.mrf.mxu0 }
 0x52b   : > { %v2789_v58 = vpop.f32.mrf.mxu0 }
 0x52d   : > { %v1185_v59 = vpop.f32.mrf.mxu0 }
 0x52e   : > { %v3028_v60 = vpack.i.bf16 %v1185_v59, %v958_v50  ;;  %v3047_v50 = vld [vmem:[%s3938_s11] sm:$0xff]  }
 0x52f   : > { %v2800_v61 = vpop.f32.mrf.mxu0 }
 0x530   : > { %3029 = vrot.lane.b32.xlu0 %v3028_v60, %s3329_s26  ;;  %v2611_v61 = vld [vmem:[%s3939_s12] ss:$0 sm:$0xff] }
 0x531   : > { %v1188_v62 = vpop.f32.mrf.mxu0 }
 0x533   : > { %v2801_v63 = vpop.f32.mrf.mxu0 }
 0x5a2   : > { %v3030_v0 = vpop.permute.xlu0 %3029 }
 0x5a3   : > { %v3032_v1 = vunpack.i.h.bf16 %v3030_v0  ;;  %v3031_v2 = vunpack.i.l.bf16 %v3030_v0 }
 0x5a5   : > { %v1195_v4 = vsel %vm744_vm2, %v1074_v55, %v3032_v1  ;;  %v968_v5 = vsel %vm744_vm2, %v847_v46, %v3031_v2 }
 0x5a6   : > { %v1196_v6 = vpack.c.bf16 %v1195_v4, %v968_v5 }
 0x5a8   : > { %2807 = vmatmul.mubr.msk.bf16.vlgmr.msra.gmra.mxu1 %vm692_vm1, %v1196_v6 }
 0x5a9   : > { %2826 = vmatprep.mubr.msk.bf16.mxu1 %vm3323_vm0, %v3322_v3  ;;  %2819 = vmatpush3.bf16.msra.mxu1 %v3044_v30 }
 0x5aa   : > { %2820 = vmatprep.subr.bf16.mxu1 %v3322_v3 }
 0x5ad   : > { %2821 = vmatpush3.bf16.msra.mxu1 %v3045_v48 }
 0x5ae   : > { %2822 = vmatprep.subr.bf16.mxu1 %v3322_v3 }
 0x5b1   : > { %2823 = vmatpush3.bf16.msra.mxu1 %v3046_v49 }
 0x5b2   : > { %2824 = vmatprep.subr.bf16.mxu1 %v3322_v3 }
 0x5b5   : > { %2825 = vmatpush3.bf16.msra.mxu1 %v3047_v50 }
 0x5b6   : > { %2844 = vmatprep.subr.bf16.mxu1 %v3322_v3 }
 0x668   : > { %v1257_v8 = vpop.f32.mrf.mxu1 }
 0x669   : > { %v1258_v9 = vadd.f32 %v2601_v7, %v1257_v8 }
 0x66a   : > { %v2808_v10 = vpop.f32.mrf.mxu1 }
 0x66b   : > { %v1264_v11 = vadd.f32 %v1258_v9, %v3572_v16 }
 0x66c   : > { %v1260_v12 = vpop.f32.mrf.mxu1 }
 0x66d   : > { %v1261_v13 = vadd.f32 %v2601_v7, %v1260_v12  ;;  %v1268_v14 = vsel %vm692_vm1, %v1264_v11, 0.0 }
 0x66e   : > { %1269 = vadd.xlane.f32.xlu1 %v1268_v14  ;;  %v2809_v15 = vpop.f32.mrf.mxu1 }
 0x66f   : > { %v1265_v18 = vadd.f32 %v1261_v13, %v3574_v17  ;;  %v3042_v17 = vld [vmem:[%s3936_s9 + $0x8] sm:$0xff]  }
 0x670   : > { %2811 = vmatpush3.bf16.msra.mxu0 %v3042_v17 }
 0x671   : > { %v1271_v19 = vsel %vm692_vm1, %v1265_v18, 0.0  ;;  %2812 = vmatprep.subr.bf16.mxu0 %v3322_v3 }
 0x672   : > { %1272 = vadd.xlane.f32.xlu0 %v1271_v19 }
 0x674   : > { %2813 = vmatpush3.bf16.msra.mxu0 %v3043_v29  ;;  %v2617_v29 = vld [vmem:[%s3940_s13] ss:$0 sm:$0xff] }
 0x675   : > { %2830 = vmatprep.subr.bf16.mxu0 %v3322_v3 }
 0x6f7   : > { %v1270_v20 = vpop.xlane.xlu1 %1269 }
 0x6f8   : > { %v1275_v21 = vmul.f32 0.03125, %v1270_v20 }
 0x6fa   : > { %v1277_v22 = vsub.f32 %v1264_v11, %v1275_v21  ;;  %v3048_v21 = vld [vmem:[%s3930_s3 + $0x18] sm:$0xff]  }
 0x6fb   : > { %v1273_v23 = vpop.xlane.xlu0 %1272 }
 0x6fc   : > { %v1276_v24 = vmul.f32 0.03125, %v1273_v23  ;;  %v1279_v25 = vmul.f32 %v1277_v22, %v1277_v22 }
 0x6fe   : > { %v1278_v26 = vsub.f32 %v1265_v18, %v1276_v24  ;;  %v1281_v16 = vsel %vm692_vm1, %v1279_v25, 0.0 }
 0x6ff   : > { %1282 = vadd.xlane.f32.xlu0 %v1281_v16 }
 0x700   : > { %v1280_v27 = vmul.f32 %v1278_v26, %v1278_v26 }
 0x702   : > { %v1284_v28 = vsel %vm692_vm1, %v1280_v27, 0.0 }
 0x703   : > { %1285 = vadd.xlane.f32.xlu1 %v1284_v28 }
 0x788   : > { %v1283_v31 = vpop.xlane.xlu0 %1282 }
 0x789   : > { %v1287_v32 = vmul.f32 0.03125, %v1283_v31 }
 0x78b   : > { %v1289_v33 = vadd.f32 1e-05, %v1287_v32 }
 0x78c   : > { %v1286_v34 = vpop.xlane.xlu1 %1285 }
 0x78d   : > { %3076 = vrsqrt.f32 %v1289_v33  ;;  %v1288_v35 = vmul.f32 0.03125, %v1286_v34  ;;  %v2618_v33 = vld [vmem:[%s3941_s14] ss:$0 sm:$0xff] }
 0x78f   : > { %v1290_v36 = vadd.f32 1e-05, %v1288_v35 }
 0x791   : > { %3078 = vrsqrt.f32 %v1290_v36 }
 0x79a   : > { %v3077_v37 = vpop.eup %3076 }
 0x79b   : > { %v1293_v38 = vmul.f32 %v3077_v37, %v1277_v22  ;;  %v3049_v22 = vld [vmem:[%s3930_s3 + $0x10] sm:$0xff]  }
 0x79d   : > { %v1301_v42 = vmul.f32 %v2605_v39, %v1293_v38  ;;  %v2623_v38 = vld [vmem:[#allocation5 + $0x1] ss:$0 sm:$0xff] }
 0x79e   : > { %v3079_v40 = vpop.eup %3078 }
 0x79f   : > { %v1294_v41 = vmul.f32 %v3079_v40, %v1278_v26  ;;  %v1309_v45 = vadd.f32 %v2606_v43, %v1301_v42 }
 0x7a1   : > { %v1302_v44 = vmul.f32 %v2605_v39, %v1294_v41 }
 0x7a3   : > { %v1310_v46 = vadd.f32 %v2606_v43, %v1302_v44 }
 0x7a5   : > { %v1311_v47 = vpack.c.bf16 %v1310_v46, %v1309_v45 }
 0x7a7   : > { %2815 = vmatmul.mubr.msk.bf16.vlgmr.msra.gmra.mxu0 %vm692_vm1, %v1311_v47 }
 0x7a8   : > { %2834 = vmatprep.mubr.msk.bf16.mxu0 %vm3323_vm0, %v3322_v3  ;;  %2831 = vmatpush3.bf16.msra.mxu0 %v3048_v21 }
 0x7a9   : > { %2832 = vmatprep.subr.bf16.mxu0 %v3322_v3 }
 0x7ac   : > { %2833 = vmatpush3.bf16.msra.mxu0 %v3049_v22 }
 0x7ad   : > { %2838 = vmatprep.subr.bf16.mxu0 %v3322_v3 }
 0x867   : > { %v1372_v52 = vpop.f32.mrf.mxu0 }
 0x868   : > { %v1373_v54 = vadd.f32 %v2607_v51, %v1372_v52 }
 0x869   : > { %v2816_v53 = vpop.f32.mrf.mxu0 }
 0x86a   : > { %v1379_v58 = vmax.f32 %v1373_v54, 0.0 }
 0x86b   : > { %v1375_v55 = vpop.f32.mrf.mxu0 }
 0x86c   : > { %v1376_v56 = vadd.f32 %v2607_v51, %v1375_v55 }
 0x86d   : > { %v2817_v57 = vpop.f32.mrf.mxu0 }
 0x86e   : > { %v1380_v59 = vmax.f32 %v1376_v56, 0.0 }
 0x870   : > { %v1381_v60 = vpack.c.bf16 %v1380_v59, %v1379_v58 }
 0x872   : > { %2827 = vmatmul.mubr.msk.bf16.vlgmr.msra.gmra.mxu1 %vm1421_vm5, %v1381_v60 }
 0x873   : > { %2846 = vmatprep.mubr.msk.bf16.mxu1 %vm3323_vm0, %v3322_v3 }
 0x932   : > { %v1459_v62 = vpop.f32.mrf.mxu1 }
 0x933   : > { %v1460_v63 = vadd.f32 %v2611_v61, %v1459_v62 }
 0x934   : > { %v2828_v0 = vpop.f32.mrf.mxu1 }
 0x935   : > { %v1466_v1 = vadd.f32 %v1460_v63, %v1309_v45 }
 0x936   : > { %v1462_v2 = vpop.f32.mrf.mxu1 }
 0x937   : > { %v1463_v4 = vadd.f32 %v2611_v61, %v1462_v2  ;;  %v1470_v5 = vsel %vm692_vm1, %v1466_v1, 0.0 }
 0x938   : > { %1471 = vadd.xlane.f32.xlu0 %v1470_v5  ;;  %v2829_v6 = vpop.f32.mrf.mxu1 }
 0x939   : > { %v1467_v7 = vadd.f32 %v1463_v4, %v1310_v46 }
 0x93b   : > { %v1473_v8 = vsel %vm692_vm1, %v1467_v7, 0.0 }
 0x93c   : > { %1474 = vadd.xlane.f32.xlu1 %v1473_v8 }
 0x9c1   : > { %v1472_v9 = vpop.xlane.xlu0 %1471 }
 0x9c2   : > { %v1476_v10 = vmul.f32 0.03125, %v1472_v9 }
 0x9c4   : > { %v1478_v11 = vsub.f32 %v1466_v1, %v1476_v10 }
 0x9c5   : > { %v1475_v12 = vpop.xlane.xlu1 %1474 }
 0x9c6   : > { %v1477_v13 = vmul.f32 0.03125, %v1475_v12  ;;  %v1480_v14 = vmul.f32 %v1478_v11, %v1478_v11 }
 0x9c8   : > { %v1479_v15 = vsub.f32 %v1467_v7, %v1477_v13  ;;  %v1482_v18 = vsel %vm692_vm1, %v1480_v14, 0.0 }
 0x9c9   : > { %1483 = vadd.xlane.f32.xlu0 %v1482_v18 }
 0x9ca   : > { %v1481_v19 = vmul.f32 %v1479_v15, %v1479_v15 }
 0x9cc   : > { %v1485_v20 = vsel %vm692_vm1, %v1481_v19, 0.0 }
 0x9cd   : > { %1486 = vadd.xlane.f32.xlu1 %v1485_v20 }
 0xa52   : > { %v1484_v23 = vpop.xlane.xlu0 %1483 }
 0xa53   : > { %v1488_v24 = vmul.f32 0.03125, %v1484_v23 }
 0xa55   : > { %v1490_v25 = vadd.f32 1e-05, %v1488_v24 }
 0xa56   : > { %v1487_v26 = vpop.xlane.xlu1 %1486 }
 0xa57   : > { %3080 = vrsqrt.f32 %v1490_v25  ;;  %v1489_v16 = vmul.f32 0.03125, %v1487_v26 }
 0xa59   : > { %v1491_v27 = vadd.f32 1e-05, %v1489_v16 }
 0xa5b   : > { %3082 = vrsqrt.f32 %v1491_v27 }
 0xa64   : > { %v3081_v28 = vpop.eup %3080 }
 0xa65   : > { %v1494_v17 = vmul.f32 %v3081_v28, %v1478_v11 }
 0xa67   : > { %v1502_v32 = vmul.f32 %v2617_v29, %v1494_v17 }
 0xa68   : > { %v3083_v30 = vpop.eup %3082 }
 0xa69   : > { %v1495_v31 = vmul.f32 %v3083_v30, %v1479_v15  ;;  %v3725_v35 = vadd.f32 %v2618_v33, %v1502_v32 }
 0xa6b   : > { %v1503_v34 = vmul.f32 %v2617_v29, %v1495_v31 }
 0xa6d   : > { %v3727_v36 = vadd.f32 %v2618_v33, %v1503_v34 }
 0xa6f   : > { %v1512_v37 = vpack.c.bf16 %v3727_v36, %v3725_v35 }
 0xa71   : > { %2835 = vmatmul.mubr.msk.bf16.vlgmr.msra.gmra.mxu0 %vm692_vm1, %v1512_v37 }
 0xa72   : > { %2840 = vmatprep.mubr.msk.bf16.mxu0 %vm3323_vm0, %v3322_v3 }
 0xb31   : > { %v1575_v39 = vpop.f32.mrf.mxu0 }
 0xb32   : > { %v1576_v40 = vadd.f32 %v2623_v38, %v1575_v39 }
 0xb33   : > { %v2836_v41 = vpop.f32.mrf.mxu0 }
 0xb34   : > { %v1582_v42 = vmul.f32 0.25, %v1576_v40  ;;  %v3734_v43 = vpack.c.bf16 %v1576_v40, %v1576_v40 }
 0xb35   : > { %v1578_v44 = vpop.f32.mrf.mxu0 }
 0xb36   : > { %v1579_v45 = vadd.f32 %v2623_v38, %v1578_v44  ;;  %1698 = vrot.lane.b32.xlu1 %v3734_v43, %s3326_s29  ;;  %1587 = vrot.lane.b32.xlu0 %v3734_v43, %s3324_s0  ;;  %v1584_v47 = vpack.c.bf16 %v1582_v42, %v1582_v42 }
 0xb37   : > { %v2837_v46 = vpop.f32.mrf.mxu0 }
 0xb38   : > { %v1583_v48 = vmul.f32 0.25, %v1579_v45  ;;  %v3740_v49 = vpack.c.bf16 %v1579_v45, %v1579_v45 }
 0xb3a   : > { %1696 = vrot.lane.b32.xlu1 %v1584_v47, %s3325_s21  ;;  %1814 = vrot.lane.b32.xlu0 %v3740_v49, %s3324_s0  ;;  %v1811_v50 = vpack.c.bf16 %v1583_v48, %v1583_v48  ;;  %s629_s0 = sand.u32 1, %s3302_s25  }
 0xb3b   : > { %s3887_s22 = scalar_lea.sflag [#allocation4], %s629_s0 }
 0xb3e   : > { %1925 = vrot.lane.b32.xlu1 %v3740_v49, %s3326_s29  ;;  %1923 = vrot.lane.b32.xlu0 %v1811_v50, %s3325_s21  ;;  %s2584_s21 = sshll.u32 %s629_s0, 4 }
 0xba8   : > { %v1588_v51 = vpop.permute.xlu0 %1587  ;;  %v1699_v53 = vpop.permute.xlu1 %1698 }
 0xba9   : > { %v1593_v52 = vsel %vm744_vm2, %v1588_v51, 0  ;;  %v1704_v54 = vsel %vm744_vm2, %v1699_v53, 0 }
 0xbaa   : > { %2839 = vmatpush3.bf16.xpose.msra.mxu0 %v1593_v52 }
 0xbab   : > { %2850 = vmatprep.subr.bf16.mxu0 %v3322_v3 }
 0xbac   : > { %v1815_v55 = vpop.permute.xlu0 %1814  ;;  %v1697_v56 = vpop.permute.xlu1 %1696 }
 0xbad   : > { %v1820_v57 = vsel %vm744_vm2, %v1815_v55, 0 }
 0xbb0   : > { %v1926_v58 = vpop.permute.xlu1 %1925  ;;  %v1924_v60 = vpop.permute.xlu0 %1923 }
 0xbb1   : > { %2841 = vmatmul.mubr.msk.bf16.vlgmr.msra.gmra.mxu0 %vm744_vm2, %v1584_v47  ;;  %v1931_v59 = vsel %vm744_vm2, %v1926_v58, 0 }
 0xbb2   : > { %2851 = vmatpush3.bf16.xpose.msra.mxu0 %v1704_v54  ;;  %2852 = vmatprep.mubr.msk.bf16.mxu0 %vm3323_vm0, %v3322_v3 }
 0xbb3   : > { %2862 = vmatprep.subr.bf16.mxu0 %v3322_v3 }
 0xbb9   : > { %2853 = vmatmul.mubr.msk.bf16.vlgmr.msra.gmra.mxu0 %vm744_vm2, %v1697_v56 }
 0xbba   : > { %2863 = vmatpush3.bf16.xpose.msra.mxu0 %v1820_v57  ;;  %2864 = vmatprep.mubr.msk.bf16.mxu0 %vm3323_vm0, %v3322_v3 }
 0xbbb   : > { %2874 = vmatprep.subr.bf16.mxu0 %v3322_v3 }
 0xbc1   : > { %2865 = vmatmul.mubr.msk.bf16.vlgmr.msra.gmra.mxu0 %vm744_vm2, %v1811_v50 }
 0xbc2   : > { %2875 = vmatpush3.bf16.xpose.msra.mxu0 %v1931_v59  ;;  %2876 = vmatprep.mubr.msk.bf16.mxu0 %vm3323_vm0, %v3322_v3 }
 0xbc3   : > { %2886 = vmatprep.subr.bf16.mxu0 %v3322_v3 }
 0xbc9   : > { %2877 = vmatmul.mubr.msk.bf16.vlgmr.msra.gmra.mxu0 %vm744_vm2, %v1924_v60 }
 0xbca   : > { %2890 = vmatprep.mubr.msk.bf16.mxu0 %vm3323_vm0, %v3322_v3 }
 0xc71   : > { %v1629_v61 = vpop.f32.mrf.mxu0 }
 0xc72   : > { %v1635_v62 = vsel %vm791_vm3, %v1629_v61, -inf }
 0xc73   : > { %1636 = vmax.xlane.f32.xlu1 %v1635_v62  ;;  %v2842_v63 = vpop.f32.mrf.mxu0 }
 0xc75   : > { %v1632_v0 = vpop.f32.mrf.mxu0 }
 0xc76   : > { %v3050_v0 = vld [vmem:[%s3932_s5 + $0x18] sm:$0xff]  }
 0xc77   : > { %v2843_v1 = vpop.f32.mrf.mxu0  ;;  %2887 = vmatpush3.bf16.msra.mxu0 %v3050_v0 }
 0xc78   : > { %2888 = vmatprep.subr.bf16.mxu0 %v3322_v3 }
 0xc79   : > { %v1740_v2 = vpop.f32.mrf.mxu0 }
 0xc7a   : > { %v1746_v4 = vsel %vm791_vm3, %v1740_v2, -inf }
 0xc7b   : > { %1747 = vmax.xlane.f32.xlu0 %v1746_v4  ;;  %v2854_v5 = vpop.f32.mrf.mxu0 }
 0xc7d   : > { %v1743_v6 = vpop.f32.mrf.mxu0 }
 0xc7f   : > { %v2855_v7 = vpop.f32.mrf.mxu0 }
 0xc81   : > { %v1856_v8 = vpop.f32.mrf.mxu0 }
 0xc82   : > { %v1862_v9 = vsel %vm791_vm3, %v1856_v8, -inf }
 0xc83   : > { %1863 = vmax.xlane.f32.xlu0 %v1862_v9  ;;  %v2866_v10 = vpop.f32.mrf.mxu0 }
 0xc85   : > { %v1859_v11 = vpop.f32.mrf.mxu0 }
 0xc86   : > { %v3051_v11 = vld [vmem:[%s3932_s5 + $0x10] sm:$0xff]  }
 0xc87   : > { %v2867_v12 = vpop.f32.mrf.mxu0  ;;  %2889 = vmatpush3.bf16.msra.mxu0 %v3051_v11 }
 0xc88   : > { %2902 = vmatprep.subr.bf16.mxu0 %v3322_v3 }
 0xc89   : > { %v1967_v13 = vpop.f32.mrf.mxu0 }
 0xc8a   : > { %v1973_v14 = vsel %vm791_vm3, %v1967_v13, -inf }
 0xc8b   : > { %1974 = vmax.xlane.f32.xlu1 %v1973_v14  ;;  %v2878_v15 = vpop.f32.mrf.mxu0 }
 0xc8d   : > { %v1970_v18 = vpop.f32.mrf.mxu0 }
 0xc8f   : > { %v2879_v19 = vpop.f32.mrf.mxu0 }
 0xcfc   : > { %v1637_v20 = vpop.xlane.xlu1 %1636 }
 0xcfd   : > { %v1638_v21 = vsub.f32 %v1629_v61, %v1637_v20 }
 0xcff   : > { %v1639_v22 = vmul.f32 1.442695, %v1638_v21 }
 0xd01   : > { %3084 = vpow2.f32 %v1639_v22 }
 0xd04   : > { %v1748_v23 = vpop.xlane.xlu0 %1747 }
 0xd05   : > { %v1749_v24 = vsub.f32 %v1740_v2, %v1748_v23 }
 0xd07   : > { %v1750_v25 = vmul.f32 1.442695, %v1749_v24 }
 0xd09   : > { %3086 = vpow2.f32 %v1750_v25 }
 0xd0c   : > { %v1864_v26 = vpop.xlane.xlu0 %1863 }
 0xd0d   : > { %v1865_v16 = vsub.f32 %v1856_v8, %v1864_v26 }
 0xd0e   : > { %v3085_v27 = vpop.eup %3084 }
 0xd0f   : > { %v1866_v28 = vmul.f32 1.442695, %v1865_v16  ;;  %v1641_v17 = vsel %vm791_vm3, %v3085_v27, 0.0 }
 0xd10   : > { %1642 = vadd.xlane.f32.xlu0 %v1641_v17 }
 0xd11   : > { %3088 = vpow2.f32 %v1866_v28 }
 0xd14   : > { %v1975_v33 = vpop.xlane.xlu1 %1974 }
 0xd15   : > { %v1976_v34 = vsub.f32 %v1967_v13, %v1975_v33 }
 0xd16   : > { %v3087_v29 = vpop.eup %3086 }
 0xd17   : > { %v1752_v30 = vsel %vm791_vm3, %v3087_v29, 0.0  ;;  %v1977_v37 = vmul.f32 1.442695, %v1976_v34 }
 0xd18   : > { %1753 = vadd.xlane.f32.xlu1 %v1752_v30 }
 0xd19   : > { %3090 = vpow2.f32 %v1977_v37 }
 0xd1e   : > { %v3089_v31 = vpop.eup %3088 }
 0xd1f   : > { %v1868_v32 = vsel %vm791_vm3, %v3089_v31, 0.0 }
 0xd20   : > { %1869 = vadd.xlane.f32.xlu0 %v1868_v32 }
 0xd26   : > { %v3091_v38 = vpop.eup %3090 }
 0xd27   : > { %v1979_v39 = vsel %vm791_vm3, %v3091_v38, 0.0 }
 0xd29   : > { %1758 = vrot.lane.b32.xlu1 %v3734_v43, %s3328_s17 }
 0xd36   : > { %1647 = vrot.lane.b32.xlu0 %v3734_v43, %s3327_s19 }
 0xd3a   : > { %1985 = vrot.lane.b32.xlu0 %v3740_v49, %s3328_s17  ;;  %s631_s17 = scalar_lea.vmem [#allocation11], %s2584_s21  ;;  %s3244_s21 = scalar_lea.vmem %s3243_s23, 512 }
 0xd4d   : > { %1980 = vadd.xlane.f32.xlu1 %v1979_v39 }
 0xd5e   : > { %1874 = vrot.lane.b32.xlu1 %v3740_v49, %s3327_s19 }
 0xd99   : > { %v1643_v40 = vpop.xlane.xlu0 %1642 }
 0xd9a   : > { %3092 = vrcp.f32 %v1643_v40 }
 0xda1   : > { %v1754_v41 = vpop.xlane.xlu1 %1753 }
 0xda2   : > { %3094 = vrcp.f32 %v1754_v41 }
 0xda5   : > { %v1759_v47 = vpop.permute.xlu1 %1758 }
 0xda6   : > { %v1764_v51 = vsel %vm809_vm4, %v1759_v47, 0 }
 0xda7   : > { %v3093_v42 = vpop.eup %3092 }
 0xda8   : > { %v1645_v45 = vmul.f32 %v3093_v42, %v3085_v27  ;;  %v2639_v27 = vld [vmem:[#allocation7 + $0x1] ss:$0 sm:$0xff] }
 0xda9   : > { %v1870_v44 = vpop.xlane.xlu0 %1869 }
 0xdaa   : > { %v1646_v48 = vpack.c.bf16 %v1645_v45, %v1645_v45  ;;  %3096 = vrcp.f32 %v1870_v44 }
 0xdad   : > { %v1648_v43 = vpop.permute.xlu0 %1647 }
 0xdae   : > { %v1653_v46 = vsel %vm809_vm4, %v1648_v43, 0 }
 0xdaf   : > { %2845 = vmatpush3.bf16.msra.mxu1 %v1653_v46  ;;  %v3095_v50 = vpop.eup %3094 }
 0xdb0   : > { %2856 = vmatprep.subr.bf16.mxu1 %v3322_v3  ;;  %v1756_v49 = vmul.f32 %v3095_v50, %v3087_v29  ;;  %v3054_v50 = vld [vmem:[%s3938_s11 + $0x38] sm:$0xff]  }
 0xdb1   : > { %v1986_v58 = vpop.permute.xlu0 %1985 }
 0xdb2   : > { %2847 = vmatmul.mubr.msk.bf16.vlgmr.msra.gmra.mxu1 %vm791_vm3, %v1646_v48  ;;  %v1757_v52 = vpack.c.bf16 %v1756_v49, %v1756_v49  ;;  %v1991_v60 = vsel %vm809_vm4, %v1986_v58, 0  ;;  %v3053_v48 = vld [vmem:[%s3936_s9 + $0x10] sm:$0xff]  }
 0xdb3   : > { %2857 = vmatpush3.bf16.msra.mxu1 %v1764_v51  ;;  %2858 = vmatprep.mubr.msk.bf16.mxu1 %vm3323_vm0, %v3322_v3  ;;  %v2643_v58 = vld [vmem:[#allocation8 + $0x1] ss:$0 sm:$0xff] }
 0xdb4   : > { %2868 = vmatprep.subr.bf16.mxu1 %v3322_v3 }
 0xdb7   : > { %v3097_v53 = vpop.eup %3096 }
 0xdb8   : > { %v1872_v55 = vmul.f32 %v3097_v53, %v3089_v31 }
 0xdba   : > { %2859 = vmatmul.mubr.msk.bf16.vlgmr.msra.gmra.mxu1 %vm791_vm3, %v1757_v52  ;;  %v1873_v59 = vpack.c.bf16 %v1872_v55, %v1872_v55 }
 0xdbb   : > { %2870 = vmatprep.mubr.msk.bf16.mxu1 %vm3323_vm0, %v3322_v3 }
 0xdd6   : > { %v1981_v54 = vpop.xlane.xlu1 %1980 }
 0xdd7   : > { %3098 = vrcp.f32 %v1981_v54 }
 0xdda   : > { %v1875_v56 = vpop.permute.xlu1 %1874 }
 0xddb   : > { %v1880_v57 = vsel %vm809_vm4, %v1875_v56, 0 }
 0xddc   : > { %2869 = vmatpush3.bf16.msra.mxu1 %v1880_v57 }
 0xddd   : > { %2880 = vmatprep.subr.bf16.mxu1 %v3322_v3 }
 0xddf   : > { %2871 = vmatmul.mubr.msk.bf16.vlgmr.msra.gmra.mxu1 %vm791_vm3, %v1873_v59 }
 0xde0   : > { %2881 = vmatpush3.bf16.msra.mxu1 %v1991_v60  ;;  %2882 = vmatprep.mubr.msk.bf16.mxu1 %vm3323_vm0, %v3322_v3 }
 0xde1   : > { %2894 = vmatprep.subr.bf16.mxu1 %v3322_v3 }
 0xde4   : > { %v3099_v61 = vpop.eup %3098 }
 0xde5   : > { %v1983_v62 = vmul.f32 %v3099_v61, %v3091_v38 }
 0xde7   : > { %v1984_v63 = vpack.c.bf16 %v1983_v62, %v1983_v62  ;;  %v2644_v62 = vld [vmem:[#allocation10 + $0x1] ss:$0 sm:$0xff] }
 0xde9   : > { %2883 = vmatmul.mubr.msk.bf16.vlgmr.msra.gmra.mxu1 %vm791_vm3, %v1984_v63 }
 0xdea   : > { %2898 = vmatprep.mubr.msk.bf16.mxu1 %vm3323_vm0, %v3322_v3 }
 0xe72   : > { %v1689_v1 = vpop.f32.mrf.mxu1 }
 0xe74   : > { %v2848_v2 = vpop.f32.mrf.mxu1 }
 0xe76   : > { %v1692_v4 = vpop.f32.mrf.mxu1 }
 0xe77   : > { %v3055_v4 = vld [vmem:[%s3938_s11 + $0x30] sm:$0xff]  }
 0xe78   : > { %v2849_v5 = vpop.f32.mrf.mxu1 }
 0xe79   : > { %v3056_v5 = vld [vmem:[%s3938_s11 + $0x28] sm:$0xff]  }
 0xe7a   : > { %v1800_v6 = vpop.f32.mrf.mxu1 }
 0xe7c   : > { %v2860_v7 = vpop.f32.mrf.mxu1 }
 0xe7d   : > { %v2650_v7 = vld [vmem:[%s3937_s10 + $0x1] ss:$0 sm:$0xff] }
 0xe7e   : > { %v1803_v8 = vpop.f32.mrf.mxu1 }
 0xe80   : > { %v2861_v9 = vpop.f32.mrf.mxu1 }
 0xe9f   : > { %v1916_v10 = vpop.f32.mrf.mxu1 }
 0xea1   : > { %v2872_v12 = vpop.f32.mrf.mxu1 }
 0xea3   : > { %v1919_v13 = vpop.f32.mrf.mxu1 }
 0xea5   : > { %v2873_v14 = vpop.f32.mrf.mxu1 }
 0xea9   : > { %v2027_v15 = vpop.f32.mrf.mxu1 }
 0xeaa   : > { %v3033_v18 = vpack.i.bf16 %v2027_v15, %v1800_v6  ;;  %v3057_v6 = vld [vmem:[%s3938_s11 + $0x20] sm:$0xff]  }
 0xeab   : > { %v2884_v19 = vpop.f32.mrf.mxu1 }
 0xeac   : > { %3034 = vrot.lane.b32.xlu1 %v3033_v18, %s3329_s26  ;;  %v2663_v19 = vld [vmem:[%s3939_s12 + $0x1] ss:$0 sm:$0xff]  ;;  %s2446_s26 = sshll.u32 %s631_s17, 4  ;;  %s3880_s26 = int_to_ptr.vmem [resolvable:$true] %s2446_s26 }
 0xead   : > { %v2030_v20 = vpop.f32.mrf.mxu1  ;;  %s3238_s24 = scalar_lea.vmem %s3880_s26, 256  ;;  %p3245_p7 = scmp.lt.s32.totalorder %s3880_s26, %s3243_s23 }
 0xeae   : > { %p3239_p4 = scmp.ne.s32.totalorder %s3880_s26, %s3238_s24  ;;  %p3246_p11 = scmp.lt.s32.totalorder %s3244_s21, %s3238_s24 }
 0xeaf   : > { %v2885_v21 = vpop.f32.mrf.mxu1 }
 0xeb0   : > { %p3240_p9 = pnand %p3239_p4, %p3461_p5  ;;  %p3247_p13 = por %p3246_p11, %p3245_p7 }
 0xeb2   : > { %p3241_p8 = pneg %p3240_p9 }
 0xeb4   : > { %p3248_p0 = pnand %p3247_p13, %p3241_p8 }
 0xf1e   : > { %v3035_v22 = vpop.permute.xlu1 %3034 }
 0xf1f   : > { %v3037_v23 = vunpack.i.h.bf16 %v3035_v22  ;;  %v3036_v24 = vunpack.i.l.bf16 %v3035_v22 }
 0xf21   : > { %v2037_v25 = vsel %vm744_vm2, %v1916_v10, %v3037_v23  ;;  %v1810_v26 = vsel %vm744_vm2, %v1689_v1, %v3036_v24 }
 0xf22   : > { %v2038_v16 = vpack.c.bf16 %v2037_v25, %v1810_v26 }
 0xf24   : > { %2891 = vmatmul.mubr.msk.bf16.vlgmr.msra.gmra.mxu0 %vm692_vm1, %v2038_v16 }
 0xf25   : > { %2910 = vmatprep.mubr.msk.bf16.mxu0 %vm3323_vm0, %v3322_v3  ;;  %2903 = vmatpush3.bf16.msra.mxu0 %v3054_v50 }
 0xf26   : > { %2904 = vmatprep.subr.bf16.mxu0 %v3322_v3 }
 0xf29   : > { %2905 = vmatpush3.bf16.msra.mxu0 %v3055_v4 }
 0xf2a   : > { %2906 = vmatprep.subr.bf16.mxu0 %v3322_v3 }
 0xf2d   : > { %2907 = vmatpush3.bf16.msra.mxu0 %v3056_v5 }
 0xf2e   : > { %2908 = vmatprep.subr.bf16.mxu0 %v3322_v3 }
 0xf31   : > { %2909 = vmatpush3.bf16.msra.mxu0 %v3057_v6 }
 0xfe4   : > { %v2101_v28 = vpop.f32.mrf.mxu0 }
 0xfe5   : > { %v2102_v17 = vadd.f32 %v2639_v27, %v2101_v28 }
 0xfe6   : > { %v2892_v29 = vpop.f32.mrf.mxu0 }
 0xfe7   : > { %v2108_v30 = vadd.f32 %v2102_v17, %v3725_v35 }
 0xfe8   : > { %v2104_v31 = vpop.f32.mrf.mxu0 }
 0xfe9   : > { %v2105_v32 = vadd.f32 %v2639_v27, %v2104_v31  ;;  %v2114_v33 = vsel %vm692_vm1, %v2108_v30, 0.0 }
 0xfea   : > { %2115 = vadd.xlane.f32.xlu0 %v2114_v33  ;;  %v2893_v34 = vpop.f32.mrf.mxu0 }
 0xfeb   : > { %v2109_v37 = vadd.f32 %v2105_v32, %v3727_v36  ;;  %v3052_v36 = vld [vmem:[%s3936_s9 + $0x18] sm:$0xff]  }
 0xfec   : > { %2895 = vmatpush3.bf16.msra.mxu1 %v3052_v36 }
 0xfed   : > { %v2117_v38 = vsel %vm692_vm1, %v2109_v37, 0.0  ;;  %2896 = vmatprep.subr.bf16.mxu1 %v3322_v3 }
 0xfee   : > { %2118 = vadd.xlane.f32.xlu1 %v2117_v38 }
 0xff0   : > { %2897 = vmatpush3.bf16.msra.mxu1 %v3053_v48  ;;  %v2671_v48 = vld [vmem:[%s3940_s13 + $0x1] ss:$0 sm:$0xff] }
 0xff1   : > { %2914 = vmatprep.subr.bf16.mxu1 %v3322_v3 }
0x1073   : > { %v2116_v39 = vpop.xlane.xlu0 %2115 }
0x1074   : > { %v2120_v40 = vmul.f32 0.03125, %v2116_v39 }
0x1076   : > { %v2122_v41 = vsub.f32 %v2108_v30, %v2120_v40  ;;  %v3058_v40 = vld [vmem:[%s3942_s15 + $0x8] sm:$0xff]  }
0x1077   : > { %v2119_v42 = vpop.xlane.xlu1 %2118 }
0x1078   : > { %v2121_v44 = vmul.f32 0.03125, %v2119_v42  ;;  %v2124_v45 = vmul.f32 %v2122_v41, %v2122_v41 }
0x107a   : > { %v2123_v43 = vsub.f32 %v2109_v37, %v2121_v44  ;;  %v2126_v35 = vsel %vm692_vm1, %v2124_v45, 0.0 }
0x107b   : > { %2127 = vadd.xlane.f32.xlu0 %v2126_v35 }
0x107c   : > { %v2125_v46 = vmul.f32 %v2123_v43, %v2123_v43 }
0x107e   : > { %v2129_v47 = vsel %vm692_vm1, %v2125_v46, 0.0 }
0x107f   : > { %2130 = vadd.xlane.f32.xlu0 %v2129_v47 }
0x1104   : > { %v2128_v51 = vpop.xlane.xlu0 %2127 }
0x1105   : > { %v2132_v49 = vmul.f32 0.03125, %v2128_v51 }
0x1107   : > { %v2134_v52 = vadd.f32 1e-05, %v2132_v49  ;;  %v2672_v49 = vld [vmem:[%s3941_s14 + $0x1] ss:$0 sm:$0xff] }
0x1108   : > { %v2131_v53 = vpop.xlane.xlu0 %2130 }
0x1109   : > { %3100 = vrsqrt.f32 %v2134_v52  ;;  %v2133_v54 = vmul.f32 0.03125, %v2131_v53 }
0x110b   : > { %v2135_v55 = vadd.f32 1e-05, %v2133_v54 }
0x110d   : > { %3102 = vrsqrt.f32 %v2135_v55 }
0x1116   : > { %v3101_v56 = vpop.eup %3100 }
0x1117   : > { %v2138_v57 = vmul.f32 %v3101_v56, %v2122_v41  ;;  %v3059_v41 = vld [vmem:[%s3942_s15] sm:$0xff]  }
0x1118   : > { %v2673_v56 = vld [vmem:[%s3943_s16] ss:$0 sm:$0xff] }
0x1119   : > { %v2146_v61 = vmul.f32 %v2643_v58, %v2138_v57 }
0x111a   : > { %v3103_v59 = vpop.eup %3102 }
0x111b   : > { %v2139_v60 = vmul.f32 %v3103_v59, %v2123_v43  ;;  %v2154_v0 = vadd.f32 %v2644_v62, %v2146_v61 }
0x111d   : > { %v2147_v63 = vmul.f32 %v2643_v58, %v2139_v60 }
0x111f   : > { %v2155_v1 = vadd.f32 %v2644_v62, %v2147_v63 }
0x1121   : > { %v2156_v2 = vpack.c.bf16 %v2155_v1, %v2154_v0 }
0x1123   : > { %2899 = vmatmul.mubr.msk.bf16.vlgmr.msra.gmra.mxu1 %vm692_vm1, %v2156_v2 }
0x1124   : > { %2918 = vmatprep.mubr.msk.bf16.mxu1 %vm3323_vm0, %v3322_v3  ;;  %2915 = vmatpush3.bf16.msra.mxu1 %v3058_v40 }
0x1125   : > { %2916 = vmatprep.subr.bf16.mxu1 %v3322_v3 }
0x1128   : > { %2917 = vmatpush3.bf16.msra.mxu1 %v3059_v41 }
0x11e3   : > { %v2219_v8 = vpop.f32.mrf.mxu1 }
0x11e4   : > { %v2220_v10 = vadd.f32 %v2650_v7, %v2219_v8 }
0x11e5   : > { %v2900_v9 = vpop.f32.mrf.mxu1 }
0x11e6   : > { %v2226_v14 = vmax.f32 %v2220_v10, 0.0 }
0x11e7   : > { %v2222_v11 = vpop.f32.mrf.mxu1 }
0x11e8   : > { %v2223_v12 = vadd.f32 %v2650_v7, %v2222_v11 }
0x11e9   : > { %v2901_v13 = vpop.f32.mrf.mxu1 }
0x11ea   : > { %v2227_v15 = vmax.f32 %v2223_v12, 0.0 }
0x11ec   : > { %v2228_v18 = vpack.c.bf16 %v2227_v15, %v2226_v14 }
0x11ee   : > { %2911 = vmatmul.mubr.msk.bf16.vlgmr.msra.gmra.mxu0 %vm1421_vm5, %v2228_v18 }
0x12ae   : > { %v2307_v20 = vpop.f32.mrf.mxu0 }
0x12af   : > { %v2308_v21 = vadd.f32 %v2663_v19, %v2307_v20 }
0x12b0   : > { %v2912_v22 = vpop.f32.mrf.mxu0 }
0x12b1   : > { %v2314_v23 = vadd.f32 %v2308_v21, %v2154_v0 }
0x12b2   : > { %v2310_v24 = vpop.f32.mrf.mxu0 }
0x12b3   : > { %v2311_v25 = vadd.f32 %v2663_v19, %v2310_v24  ;;  %v2320_v26 = vsel %vm692_vm1, %v2314_v23, 0.0 }
0x12b4   : > { %2321 = vadd.xlane.f32.xlu1 %v2320_v26  ;;  %v2913_v16 = vpop.f32.mrf.mxu0 }
0x12b5   : > { %v2315_v27 = vadd.f32 %v2311_v25, %v2155_v1 }
0x12b7   : > { %v2323_v28 = vsel %vm692_vm1, %v2315_v27, 0.0 }
0x12b8   : > { %2324 = vadd.xlane.f32.xlu0 %v2323_v28 }
0x133d   : > { %v2322_v17 = vpop.xlane.xlu1 %2321 }
0x133e   : > { %v2326_v29 = vmul.f32 0.03125, %v2322_v17 }
0x1340   : > { %v2328_v30 = vsub.f32 %v2314_v23, %v2326_v29 }
0x1341   : > { %v2325_v31 = vpop.xlane.xlu0 %2324 }
0x1342   : > { %v2327_v32 = vmul.f32 0.03125, %v2325_v31  ;;  %v2330_v33 = vmul.f32 %v2328_v30, %v2328_v30 }
0x1344   : > { %v2329_v34 = vsub.f32 %v2315_v27, %v2327_v32  ;;  %v2332_v37 = vsel %vm692_vm1, %v2330_v33, 0.0 }
0x1345   : > { %2333 = vadd.xlane.f32.xlu1 %v2332_v37 }
0x1346   : > { %v2331_v38 = vmul.f32 %v2329_v34, %v2329_v34 }
0x1348   : > { %v2335_v39 = vsel %vm692_vm1, %v2331_v38, 0.0 }
0x1349   : > { %2336 = vadd.xlane.f32.xlu0 %v2335_v39 }
0x13ce   : > { %v2334_v42 = vpop.xlane.xlu1 %2333 }
0x13cf   : > { %v2338_v44 = vmul.f32 0.03125, %v2334_v42 }
0x13d1   : > { %v2340_v45 = vadd.f32 1e-05, %v2338_v44 }
0x13d2   : > { %v2337_v43 = vpop.xlane.xlu0 %2336 }
0x13d3   : > { %3104 = vrsqrt.f32 %v2340_v45  ;;  %v2339_v35 = vmul.f32 0.03125, %v2337_v43 }
0x13d5   : > { %v2341_v46 = vadd.f32 1e-05, %v2339_v35 }
0x13d7   : > { %3106 = vrsqrt.f32 %v2341_v46 }
0x13e0   : > { %v3105_v47 = vpop.eup %3104 }
0x13e1   : > { %v2344_v36 = vmul.f32 %v3105_v47, %v2328_v30 }
0x13e3   : > { %v2352_v3 = vmul.f32 %v2671_v48, %v2344_v36 }
0x13e4   : > { %v3107_v50 = vpop.eup %3106 }
0x13e5   : > { %v2345_v51 = vmul.f32 %v3107_v50, %v2329_v34  ;;  %v2360_v53 = vadd.f32 %v2672_v49, %v2352_v3 }
0x13e7   : > { %v2353_v52 = vmul.f32 %v2671_v48, %v2345_v51 }
0x13e9   : > { %v2361_v54 = vadd.f32 %v2672_v49, %v2353_v52 }
0x13eb   : > { %v2362_v55 = vpack.c.bf16 %v2361_v54, %v2360_v53 }
0x13ed   : > { %2919 = vmatmul.mubr.msk.bf16.vlgmr.msra.gmra.mxu1 %vm692_vm1, %v2362_v55 }
0x14ad   : > { %v2423_v57 = vpop.f32.mrf.mxu1 }
0x14ae   : > { %v2424_v58 = vadd.f32 %v2673_v56, %v2423_v57 }
0x14af   : > { %v2920_v59 = vpop.f32.mrf.mxu1 }
0x14b0   : > { %2430 = vst [vmem:[%s631_s17] sm:$0xff] %v2424_v58 }
0x14b1   : > { %v2426_v60 = vpop.f32.mrf.mxu1 }
0x14b2   : > { %v2427_v61 = vadd.f32 %v2673_v56, %v2426_v60 }
0x14b3   : > { %v2921_v62 = vpop.f32.mrf.mxu1 }
0x14b4   : > { %2431 = vst [vmem:[%s631_s17 + $0x8] sm:$0xff] %v2427_v61 }
0x14b5   : > { %3251 = shalt.err (!%p3248_p0)
}
0x14b6   : > { %s3252_s0 = scalar_lea.hbm %s3885_s18, 256  ;;  %s3256_s17 = scalar_lea.hbm %s3983_s20, 512 }
0x14b7   : > { %p3253_p3 = scmp.ne.s32.totalorder %s3885_s18, %s3252_s0  ;;  %p3257_p12 = scmp.lt.s32.totalorder %s3885_s18, %s3983_s20 }
0x14b8   : > { %p3258_p10 = scmp.lt.s32.totalorder %s3256_s17, %s3252_s0 }
0x14b9   : > { %p3254_p1 = pnand %p3253_p3, %p3461_p5 }
0x14ba   : > { %p3259_p4 = por %p3258_p10, %p3257_p12 }
0x14bb   : > { %p3255_p2 = pneg %p3254_p1 }
0x14bd   : > { %p3260_p9 = pnand %p3259_p4, %p3255_p2 }
0x14bf   : > { %3263 = shalt.err (!%p3260_p9)
}
0x14c0   : > { %s3331_s4 = smov 128   ;;  %s3332_s24 = smov 8  }
0x14c1   : > { %2942 = dma.vmem_to_hbm [thread:$0]  (%p3461_p5), %s3880_s26, 256, %s3885_s18, %s3887_s22, %s3331_s4, %s3331_s4, %s3332_s24  }
0x14c2 PF: > { %s3984_s28 = sld [smem:[#allocation18_spill]] }
0x14c3   : > { %s3985_s23 = sld [smem:[#allocation16_spill]] }
0x14c8   : > { %p2974_p8 = scmp.ge.s32.totalorder %s3984_s28, 2 }
0x14c9   : > { %s2461_s29 = sand.u32 1, %s3985_s23  }
0x14ca   : > { %p2961_p7 = pnand %p2974_p8, %p3465_p6  ;;  %s2462_s0 = scalar_lea.sflag [#allocation4], %s2461_s29 }
0x14cc   : > { %p2962_p11 = pneg %p2961_p7 }
0x14ce   : > { %3293 = dma.done.wait (%p2962_p11), %s2462_s0, 256  }
0x14cf   : > { %3295 = vsyncadd (%p2962_p11), %s2462_s0, 4294967040  ;;  %s3987_s27 = sld [smem:[#allocation19_spill]]  ;;  %s3990_s24 = smov %s3302_s25 }
0x14d0   : > { %s3988_s19 = sld [smem:[#allocation17_spill]] }
0x14d1   : > { %s3989_s26 = sld [smem:[#allocation20_spill]] }
0x14d5   : > { %p30_p13 = scmp.ge.s32.totalorder %s3987_s27, 4  }
0x14d6   : > { %s3991_s25 = smov %s3988_s19 }
0x14d7   :  { %32 = sbr.rel (!%p30_p13) target bundleno = 11 (0xb), region = 159 }
0x14dc   :  { %2467 = vsyncpa [#allocation3], 1 }
0x14dd   :  { %2469 = vsyncpa [#allocation3 + $0x1], 1 }
0x14de   :  { %2470 = vsyncpa [#allocation6], 1 }
0x14df   :  { %2471 = vsyncpa [#allocation9], 1 }
0x14e0   :  { %2472 = vsyncpa [#allocation4], 1 }
0x14e1   :  { %2474 = vsyncpa [#allocation4 + $0x1], 1 }

</bundles_post_ra>
